<compile_context>
chip_gen: v5e
topology: v5e:2x2
jax: 0.10.0
libtpu: 0.0.40
codegen_flags: <defaults>
</compile_context>

<pallas_src>
import jax
import jax.numpy as jnp
from jax.experimental import pallas as pl
from jax.experimental.pallas import tpu as pltpu


def _round_up(x, m):
    return (x + m - 1) // m * m


# ---------------------------------------------------------------------------
# Fused kernel: 1x1 conv -> ReLU -> 1x1 conv -> context gating (channels-first)
# ---------------------------------------------------------------------------
def _ctx_gating_kernel(x_ref, w1_ref, w2_ref, o_ref):
    frames = x_ref.shape[0]        # F frames per grid step (static, small)
    nobj = o_ref.shape[1]          # real object count (w2 is sublane-padded)

    w1 = w1_ref[...]               # (D, D)      bf16, VMEM-resident
    w2 = w2_ref[...]               # (nobj_p, D) bf16, VMEM-resident

    for f in range(frames):        # static unroll over the few frames in this tile
        xf = x_ref[f, :, :]                                          # (D, HW) f32
        h = jnp.dot(w1, xf.astype(jnp.bfloat16),
                    preferred_element_type=jnp.float32)              # (D, HW) f32
        h = jnp.maximum(h, 0.0)                                      # ReLU in f32 (v5e-safe)
        obj = jnp.dot(w2, h.astype(jnp.bfloat16),
                      preferred_element_type=jnp.float32)            # (nobj_p, HW) f32
        # Gating: out[f, n, d, p] = x[f, d, p] * obj[n, p]
        # Re-read the activation tile from VMEM (vld is cheap) instead of keeping
        # it live across both matmuls; obj row broadcast is a sublane broadcast.
        for n in range(nobj):
            o_ref[f, n, :, :] = (x_ref[f, :, :] * obj[n:n + 1, :]).astype(o_ref.dtype)


def context_gating_objectifier(vid_feat, w1, w2, out_dtype=jnp.float32):
    """Fused obj_mapper + context gating of ContextGatingObjectifier.forward.

    vid_feat: (B, T, D, H, W) float32      (PyTorch NCHW-per-frame layout)
    w1:       (D, D)     bfloat16          first 1x1 conv weight, (Cout, Cin)
    w2:       (nobj, D)  bfloat16          second 1x1 conv weight, (Cout, Cin)
    returns:  (B, T, nobj, D, H, W) out_dtype
    """
    B, T, D, H, W = vid_feat.shape
    nobj = w2.shape[0]
    N, HW = B * T, H * W

    # Free reshape: frames x channels x pixels, no data movement.
    x = vid_feat.reshape(N, D, HW)

    # Sublane-pad the (tiny) second conv weight to a multiple of 8 rows once.
    nobj_p = max(8, _round_up(nobj, 8))
    w2p = jnp.pad(w2, ((0, nobj_p - nobj), (0, 0))) if nobj_p != nobj else w2

    # Frames per grid step: largest divisor of N whose single-buffer stream
    # footprint is ~<= 4 MiB, while keeping >= 2 grid steps so v7x's two
    # TensorCores both get work under dimension_semantics=("parallel",).
    out_itemsize = jnp.dtype(out_dtype).itemsize
    per_frame = D * HW * (vid_feat.dtype.itemsize + nobj * out_itemsize)
    target_bytes = 4 << 20
    F = 1
    for cand in range(2, N + 1):
        if N % cand:
            continue
        if cand * per_frame > target_bytes:
            break                      # cand*per_frame is monotonic in cand
        if N // cand < 2:
            continue                   # keep >= 2 grid steps when N >= 2
        F = cand
    grid = (N // F,)

    # Explicit VMEM budget: double-buffered in/out streams + resident weights.
    weight_bytes = (D * D + nobj_p * D) * 2
    vmem_bytes = 2 * F * per_frame + 2 * weight_bytes + (2 << 20)
    compiler_params = pltpu.CompilerParams(
        dimension_semantics=("parallel",),
        vmem_limit_bytes=int(max(vmem_bytes, 32 << 20)),
    )

    out = pl.pallas_call(
        _ctx_gating_kernel,
        out_shape=jax.ShapeDtypeStruct((N, nobj, D, HW), out_dtype),
        grid_spec=pltpu.PrefetchScalarGridSpec(
            num_scalar_prefetch=0,
            grid=grid,
            in_specs=[
                pl.BlockSpec((F, D, HW), lambda i: (i, 0, 0)),        # activations, tiled by frame group
                pl.BlockSpec((D, D), lambda i: (0, 0)),               # W1, resident in VMEM
                pl.BlockSpec((nobj_p, D), lambda i: (0, 0)),          # W2 (sublane-padded), resident
            ],
            # (N, nobj, D, HW): last dim HW lane-dense, full-D/full-HW blocks.
            out_specs=pl.BlockSpec((F, nobj, D, HW), lambda i: (i, 0, 0, 0)),
        ),
        compiler_params=compiler_params,
    )(x, w1, w2p)

    # Free reshape back to the PyTorch output layout.
    return out.reshape(B, T, nobj, D, H, W)


# ---------------------------------------------------------------------------
# Params + pure-JAX reference (same dtype strategy) for a correctness check
# ---------------------------------------------------------------------------
def init_params(key, dim, nobj):
    k1, k2 = jax.random.split(key)
    # PyTorch Conv2d weight layout (Cout, Cin) for 1x1 kernels.
    w1 = jax.random.normal(k1, (dim, dim), jnp.float32) / jnp.sqrt(float(dim))
    w2 = jax.random.normal(k2, (nobj, dim), jnp.float32) / jnp.sqrt(float(dim))
    # Cast weights to bf16 once at init (inference-time optimization).
    return w1.astype(jnp.bfloat16), w2.astype(jnp.bfloat16)


def reference_forward(vid_feat, w1, w2):
    B, T, D, H, W = vid_feat.shape
    x = vid_feat.reshape(B * T, D, H * W)                             # (F, D, P)
    h = jnp.einsum("od,fdp->fop", w1, x.astype(jnp.bfloat16),
                   preferred_element_type=jnp.float32)
    h = jnp.maximum(h, 0.0)
    obj = jnp.einsum("no,fop->fnp", w2, h.astype(jnp.bfloat16),
                     preferred_element_type=jnp.float32)              # (F, nobj, P)
    out = x[:, None, :, :] * obj[:, :, None, :]                       # (F, nobj, D, P)
    return out.reshape(B, T, -1, D, H, W)


if __name__ == "__main__":
    key = jax.random.PRNGKey(0)
    pkey, xkey = jax.random.split(key)

    B, T, D, H, W = 2, 4, 128, 16, 16
    NOBJ = 1
    w1, w2 = init_params(pkey, D, NOBJ)
    vid_feat = jax.random.normal(xkey, (B, T, D, H, W), jnp.float32)

    fwd = jax.jit(context_gating_objectifier)
    out = fwd(vid_feat, w1, w2)
    jax.block_until_ready(out)

    assert out.shape == (B, T, NOBJ, D, H, W)
    assert out.dtype == jnp.float32

    ref = reference_forward(vid_feat, w1, w2)
    err = float(jnp.max(jnp.abs(out - ref)))
    assert err < 1e-3, f"kernel/reference mismatch: max abs err {err}"

    print("KERNEL_OK")
</pallas_src>

<mosaic_0001>
module attributes {stable_mosaic.version = 11 : i64} {
  func.func @_ctx_gating_kernel(%arg0: i32, %arg1: memref<4x128x256xf32, #tpu.memory_space<vmem>>, %arg2: memref<128x128xbf16, #tpu.memory_space<vmem>>, %arg3: memref<8x128xbf16, #tpu.memory_space<vmem>>, %arg4: memref<4x1x128x256xf32, #tpu.memory_space<vmem>>) attributes {dimension_semantics = [#tpu.dimension_semantics<parallel>], iteration_bounds = array<i64: 2>, scalar_prefetch = 0 : i64, scratch_operands = 0 : i64, tpu.core_type = #tpu.core_type<tc>, window_params = [{transform_indices = @transform_0, window_bounds = array<i64: 4, 128, 256>}, {pipeline_mode = #tpu.pipeline_mode<synchronous>, transform_indices = @transform_1, window_bounds = array<i64: 128, 128>}, {pipeline_mode = #tpu.pipeline_mode<synchronous>, transform_indices = @transform_2, window_bounds = array<i64: 8, 128>}, {transform_indices = @transform_3, window_bounds = array<i64: 4, 1, 128, 256>}]} {
    %c0 = arith.constant 0 : index
    %c0_0 = arith.constant 0 : index
    %0 = vector.load %arg2[%c0, %c0_0] : memref<128x128xbf16, #tpu.memory_space<vmem>>, vector<128x128xbf16>
    %c0_1 = arith.constant 0 : index
    %c0_2 = arith.constant 0 : index
    %1 = vector.load %arg3[%c0_1, %c0_2] : memref<8x128xbf16, #tpu.memory_space<vmem>>, vector<8x128xbf16>
    %c0_3 = arith.constant 0 : index
    %c0_4 = arith.constant 0 : index
    %c0_5 = arith.constant 0 : index
    %2 = vector.load %arg1[%c0_3, %c0_4, %c0_5] : memref<4x128x256xf32, #tpu.memory_space<vmem>>, vector<1x128x256xf32>
    %3 = vector.shape_cast %2 : vector<1x128x256xf32> to vector<128x256xf32>
    %4 = arith.truncf %3 : vector<128x256xf32> to vector<128x256xbf16>
    %cst = arith.constant dense<0.000000e+00> : vector<128x256xf32>
    %5 = tpu.matmul %0, %4, %cst {dimension_numbers = #tpu.dot_dimension_numbers<[1], [0], [0], [1], [0, 0, 1, 1], [], []>} : vector<128x128xbf16>, vector<128x256xbf16>, vector<128x256xf32> -> vector<128x256xf32>
    %cst_6 = arith.constant 0.000000e+00 : f32
    %6 = vector.broadcast %cst_6 : f32 to vector<128x256xf32>
    %7 = arith.maximumf %5, %6 : vector<128x256xf32>
    %8 = arith.truncf %7 : vector<128x256xf32> to vector<128x256xbf16>
    %cst_7 = arith.constant dense<0.000000e+00> : vector<8x256xf32>
    %9 = tpu.matmul %1, %8, %cst_7 {dimension_numbers = #tpu.dot_dimension_numbers<[1], [0], [0], [1], [0, 0, 1, 1], [], []>} : vector<8x128xbf16>, vector<128x256xbf16>, vector<8x256xf32> -> vector<8x256xf32>
    %c0_8 = arith.constant 0 : index
    %c0_9 = arith.constant 0 : index
    %c0_10 = arith.constant 0 : index
    %10 = vector.load %arg1[%c0_8, %c0_9, %c0_10] : memref<4x128x256xf32, #tpu.memory_space<vmem>>, vector<1x128x256xf32>
    %11 = vector.shape_cast %10 : vector<1x128x256xf32> to vector<128x256xf32>
    %12 = vector.extract_strided_slice %9 {offsets = [0, 0], sizes = [1, 256], strides = [1, 1]} : vector<8x256xf32> to vector<1x256xf32>
    %13 = vector.broadcast %12 : vector<1x256xf32> to vector<128x256xf32>
    %14 = arith.mulf %11, %13 : vector<128x256xf32>
    %c0_11 = arith.constant 0 : index
    %c0_12 = arith.constant 0 : index
    %c0_13 = arith.constant 0 : index
    %c0_14 = arith.constant 0 : index
    %15 = vector.load %arg4[%c0_11, %c0_12, %c0_13, %c0_14] : memref<4x1x128x256xf32, #tpu.memory_space<vmem>>, vector<1x1x128x256xf32>
    %16 = vector.shape_cast %15 : vector<1x1x128x256xf32> to vector<128x256xf32>
    %17 = vector.shape_cast %14 : vector<128x256xf32> to vector<1x1x128x256xf32>
    tpu.vector_store %arg4[%c0_11, %c0_12, %c0_13, %c0_14], %17 {strides = array<i32>} : memref<4x1x128x256xf32, #tpu.memory_space<vmem>>, vector<1x1x128x256xf32>,
    %c1 = arith.constant 1 : index
    %c0_15 = arith.constant 0 : index
    %c0_16 = arith.constant 0 : index
    %18 = vector.load %arg1[%c1, %c0_15, %c0_16] : memref<4x128x256xf32, #tpu.memory_space<vmem>>, vector<1x128x256xf32>
    %19 = vector.shape_cast %18 : vector<1x128x256xf32> to vector<128x256xf32>
    %20 = arith.truncf %19 : vector<128x256xf32> to vector<128x256xbf16>
    %cst_17 = arith.constant dense<0.000000e+00> : vector<128x256xf32>
    %21 = tpu.matmul %0, %20, %cst_17 {dimension_numbers = #tpu.dot_dimension_numbers<[1], [0], [0], [1], [0, 0, 1, 1], [], []>} : vector<128x128xbf16>, vector<128x256xbf16>, vector<128x256xf32> -> vector<128x256xf32>
    %cst_18 = arith.constant 0.000000e+00 : f32
    %22 = vector.broadcast %cst_18 : f32 to vector<128x256xf32>
    %23 = arith.maximumf %21, %22 : vector<128x256xf32>
    %24 = arith.truncf %23 : vector<128x256xf32> to vector<128x256xbf16>
    %cst_19 = arith.constant dense<0.000000e+00> : vector<8x256xf32>
    %25 = tpu.matmul %1, %24, %cst_19 {dimension_numbers = #tpu.dot_dimension_numbers<[1], [0], [0], [1], [0, 0, 1, 1], [], []>} : vector<8x128xbf16>, vector<128x256xbf16>, vector<8x256xf32> -> vector<8x256xf32>
    %c1_20 = arith.constant 1 : index
    %c0_21 = arith.constant 0 : index
    %c0_22 = arith.constant 0 : index
    %26 = vector.load %arg1[%c1_20, %c0_21, %c0_22] : memref<4x128x256xf32, #tpu.memory_space<vmem>>, vector<1x128x256xf32>
    %27 = vector.shape_cast %26 : vector<1x128x256xf32> to vector<128x256xf32>
    %28 = vector.extract_strided_slice %25 {offsets = [0, 0], sizes = [1, 256], strides = [1, 1]} : vector<8x256xf32> to vector<1x256xf32>
    %29 = vector.broadcast %28 : vector<1x256xf32> to vector<128x256xf32>
    %30 = arith.mulf %27, %29 : vector<128x256xf32>
    %c1_23 = arith.constant 1 : index
    %c0_24 = arith.constant 0 : index
    %c0_25 = arith.constant 0 : index
    %c0_26 = arith.constant 0 : index
    %31 = vector.load %arg4[%c1_23, %c0_24, %c0_25, %c0_26] : memref<4x1x128x256xf32, #tpu.memory_space<vmem>>, vector<1x1x128x256xf32>
    %32 = vector.shape_cast %31 : vector<1x1x128x256xf32> to vector<128x256xf32>
    %33 = vector.shape_cast %30 : vector<128x256xf32> to vector<1x1x128x256xf32>
    tpu.vector_store %arg4[%c1_23, %c0_24, %c0_25, %c0_26], %33 {strides = array<i32>} : memref<4x1x128x256xf32, #tpu.memory_space<vmem>>, vector<1x1x128x256xf32>,
    %c2 = arith.constant 2 : index
    %c0_27 = arith.constant 0 : index
    %c0_28 = arith.constant 0 : index
    %34 = vector.load %arg1[%c2, %c0_27, %c0_28] : memref<4x128x256xf32, #tpu.memory_space<vmem>>, vector<1x128x256xf32>
    %35 = vector.shape_cast %34 : vector<1x128x256xf32> to vector<128x256xf32>
    %36 = arith.truncf %35 : vector<128x256xf32> to vector<128x256xbf16>
    %cst_29 = arith.constant dense<0.000000e+00> : vector<128x256xf32>
    %37 = tpu.matmul %0, %36, %cst_29 {dimension_numbers = #tpu.dot_dimension_numbers<[1], [0], [0], [1], [0, 0, 1, 1], [], []>} : vector<128x128xbf16>, vector<128x256xbf16>, vector<128x256xf32> -> vector<128x256xf32>
    %cst_30 = arith.constant 0.000000e+00 : f32
    %38 = vector.broadcast %cst_30 : f32 to vector<128x256xf32>
    %39 = arith.maximumf %37, %38 : vector<128x256xf32>
    %40 = arith.truncf %39 : vector<128x256xf32> to vector<128x256xbf16>
    %cst_31 = arith.constant dense<0.000000e+00> : vector<8x256xf32>
    %41 = tpu.matmul %1, %40, %cst_31 {dimension_numbers = #tpu.dot_dimension_numbers<[1], [0], [0], [1], [0, 0, 1, 1], [], []>} : vector<8x128xbf16>, vector<128x256xbf16>, vector<8x256xf32> -> vector<8x256xf32>
    %c2_32 = arith.constant 2 : index
    %c0_33 = arith.constant 0 : index
    %c0_34 = arith.constant 0 : index
    %42 = vector.load %arg1[%c2_32, %c0_33, %c0_34] : memref<4x128x256xf32, #tpu.memory_space<vmem>>, vector<1x128x256xf32>
    %43 = vector.shape_cast %42 : vector<1x128x256xf32> to vector<128x256xf32>
    %44 = vector.extract_strided_slice %41 {offsets = [0, 0], sizes = [1, 256], strides = [1, 1]} : vector<8x256xf32> to vector<1x256xf32>
    %45 = vector.broadcast %44 : vector<1x256xf32> to vector<128x256xf32>
    %46 = arith.mulf %43, %45 : vector<128x256xf32>
    %c2_35 = arith.constant 2 : index
    %c0_36 = arith.constant 0 : index
    %c0_37 = arith.constant 0 : index
    %c0_38 = arith.constant 0 : index
    %47 = vector.load %arg4[%c2_35, %c0_36, %c0_37, %c0_38] : memref<4x1x128x256xf32, #tpu.memory_space<vmem>>, vector<1x1x128x256xf32>
    %48 = vector.shape_cast %47 : vector<1x1x128x256xf32> to vector<128x256xf32>
    %49 = vector.shape_cast %46 : vector<128x256xf32> to vector<1x1x128x256xf32>
    tpu.vector_store %arg4[%c2_35, %c0_36, %c0_37, %c0_38], %49 {strides = array<i32>} : memref<4x1x128x256xf32, #tpu.memory_space<vmem>>, vector<1x1x128x256xf32>,
    %c3 = arith.constant 3 : index
    %c0_39 = arith.constant 0 : index
    %c0_40 = arith.constant 0 : index
    %50 = vector.load %arg1[%c3, %c0_39, %c0_40] : memref<4x128x256xf32, #tpu.memory_space<vmem>>, vector<1x128x256xf32>
    %51 = vector.shape_cast %50 : vector<1x128x256xf32> to vector<128x256xf32>
    %52 = arith.truncf %51 : vector<128x256xf32> to vector<128x256xbf16>
    %cst_41 = arith.constant dense<0.000000e+00> : vector<128x256xf32>
    %53 = tpu.matmul %0, %52, %cst_41 {dimension_numbers = #tpu.dot_dimension_numbers<[1], [0], [0], [1], [0, 0, 1, 1], [], []>} : vector<128x128xbf16>, vector<128x256xbf16>, vector<128x256xf32> -> vector<128x256xf32>
    %cst_42 = arith.constant 0.000000e+00 : f32
    %54 = vector.broadcast %cst_42 : f32 to vector<128x256xf32>
    %55 = arith.maximumf %53, %54 : vector<128x256xf32>
    %56 = arith.truncf %55 : vector<128x256xf32> to vector<128x256xbf16>
    %cst_43 = arith.constant dense<0.000000e+00> : vector<8x256xf32>
    %57 = tpu.matmul %1, %56, %cst_43 {dimension_numbers = #tpu.dot_dimension_numbers<[1], [0], [0], [1], [0, 0, 1, 1], [], []>} : vector<8x128xbf16>, vector<128x256xbf16>, vector<8x256xf32> -> vector<8x256xf32>
    %c3_44 = arith.constant 3 : index
    %c0_45 = arith.constant 0 : index
    %c0_46 = arith.constant 0 : index
    %58 = vector.load %arg1[%c3_44, %c0_45, %c0_46] : memref<4x128x256xf32, #tpu.memory_space<vmem>>, vector<1x128x256xf32>
    %59 = vector.shape_cast %58 : vector<1x128x256xf32> to vector<128x256xf32>
    %60 = vector.extract_strided_slice %57 {offsets = [0, 0], sizes = [1, 256], strides = [1, 1]} : vector<8x256xf32> to vector<1x256xf32>
    %61 = vector.broadcast %60 : vector<1x256xf32> to vector<128x256xf32>
    %62 = arith.mulf %59, %61 : vector<128x256xf32>
    %c3_47 = arith.constant 3 : index
    %c0_48 = arith.constant 0 : index
    %c0_49 = arith.constant 0 : index
    %c0_50 = arith.constant 0 : index
    %63 = vector.load %arg4[%c3_47, %c0_48, %c0_49, %c0_50] : memref<4x1x128x256xf32, #tpu.memory_space<vmem>>, vector<1x1x128x256xf32>
    %64 = vector.shape_cast %63 : vector<1x1x128x256xf32> to vector<128x256xf32>
    %65 = vector.shape_cast %62 : vector<128x256xf32> to vector<1x1x128x256xf32>
    tpu.vector_store %arg4[%c3_47, %c0_48, %c0_49, %c0_50], %65 {strides = array<i32>} : memref<4x1x128x256xf32, #tpu.memory_space<vmem>>, vector<1x1x128x256xf32>,
    return
  }
  func.func @transform_0(%arg0: i32) -> (i32, i32, i32) {
    %c0_i32 = arith.constant 0 : i32
    %c0_i32_0 = arith.constant 0 : i32
    %c0_i32_1 = arith.constant 0 : i32
    return %arg0, %c0_i32, %c0_i32_0 : i32, i32, i32
  }
  func.func @transform_1(%arg0: i32) -> (i32, i32) {
    %c0_i32 = arith.constant 0 : i32
    %c0_i32_0 = arith.constant 0 : i32
    %c0_i32_1 = arith.constant 0 : i32
    return %c0_i32, %c0_i32_0 : i32, i32
  }
  func.func @transform_2(%arg0: i32) -> (i32, i32) {
    %c0_i32 = arith.constant 0 : i32
    %c0_i32_0 = arith.constant 0 : i32
    %c0_i32_1 = arith.constant 0 : i32
    return %c0_i32, %c0_i32_0 : i32, i32
  }
  func.func @transform_3(%arg0: i32) -> (i32, i32, i32, i32) {
    %c0_i32 = arith.constant 0 : i32
    %c0_i32_0 = arith.constant 0 : i32
    %c0_i32_1 = arith.constant 0 : i32
    %c0_i32_2 = arith.constant 0 : i32
    return %arg0, %c0_i32, %c0_i32_0, %c0_i32_1 : i32, i32, i32, i32
  }
}

</mosaic_0001>

<bundles_post_ra>
// kernel: context_gating_objectifier.1
= control target key start
LH: loop header
LB: loop body
LE: loop exit
PB: predicated region body
PF: predicated region fallthrough
CT: control target
= control target key end

     0   :  { %s1744_s12 = smov 0   ;;  %s2762_s0 = inlined_call_operand.vmem [shape: f32[8,128,256], index: 0, kind: input, shape index: {}]   ;;  %s2763_s1 = inlined_call_operand.vmem [shape: bf16[128,128], index: 1, kind: input, shape index: {}]   ;;  %s2764_s2 = inlined_call_operand.vmem [shape: bf16[8,128], index: 2, kind: input, shape index: {}]   ;;  %s2765_s3 = inlined_call_operand.vmem [shape: f32[8,1,128,256], index: 3, kind: output, shape index: {}]  }
   0x1 LB: > { %s1452_s13 = sadd.s32 4294967295, %s1722_s12   ;;  %p1456_p0 = scmp.ge.s32.totalorder %s1722_s12, 1  ;;  %s1722_s12 = sphi %s1744_s12, %s13_s12  }
   0x2   : > { %p139_p1 = scmp.lt.s32.totalorder %s1722_s12, 3 }
   0x4   : > { %p140_p2 = pnand %p1456_p0, %p139_p1 }
   0x6   : > { %143 = sbr.rel (%p140_p2) target bundleno = 1445 (0x5a5), region = 32 }
   0xb   : > { %s1457_s14 = sshll.u32 %s1452_s13, 2  ;;  %v1893_v48 = vld [vmem:[%s2763_s1] sm:$0xff]  ;;  %v1900_v49 = vld [vmem:[%s2763_s1 + $0x8] sm:$0xff]  ;;  %v1907_v50 = vld [vmem:[%s2763_s1 + $0x10] sm:$0xff] }
   0xc   : > { %p166_p3 = scmp.lt.s32.totalorder %s1457_s14, 7  ;;  %v1914_v51 = vld [vmem:[%s2763_s1 + $0x18] sm:$0xff]  ;;  %v1921_v52 = vld [vmem:[%s2763_s1 + $0x20] sm:$0xff]  ;;  %v1928_v53 = vld [vmem:[%s2763_s1 + $0x28] sm:$0xff] }
   0xd   : > { %v1935_v54 = vld [vmem:[%s2763_s1 + $0x30] sm:$0xff]  ;;  %v1942_v55 = vld [vmem:[%s2763_s1 + $0x38] sm:$0xff] }
   0xe   : > { %s2965_s14 = smov (!%p166_p3, %s1457_s14), 7  ;;  %2856 = vst [vmem:[#allocation25_spill] sm:$0xff] %v1942_v55 }
   0xf   : > { %s1689_s15 = sshll.u32 %s2965_s14, 8 }
  0x10   : > { %s1760_s18 = scalar_lea.vmem %s2762_s0, %s1689_s15  ;;  %s2136_s13 = scalar_lea.vmem %s2765_s3, %s1689_s15 }
  0x11   : > { %v1763_v0 = vld [vmem:[%s1760_s18 + $0xe0] sm:$0xff]  ;;  %v1766_v1 = vld [vmem:[%s1760_s18 + $0xf0] sm:$0xff]  ;;  %v1769_v2 = vld [vmem:[%s1760_s18 + $0xe8] sm:$0xff] }
  0x12   : > { %2833 = vst [vmem:[#allocation2_spill] sm:$0xff] %v1763_v0  ;;  %v242_v3 = vpack.c.bf16 %v1766_v1, %v1763_v0  ;;  %v1774_v4 = vld [vmem:[%s1760_s18 + $0xf8] sm:$0xff]  ;;  %v1777_v5 = vld [vmem:[%s1760_s18 + $0xc0] sm:$0xff]  ;;  %v1780_v6 = vld [vmem:[%s1760_s18 + $0xd0] sm:$0xff] }
  0x13   : > { %2834 = vst [vmem:[#allocation3_spill] sm:$0xff] %v1766_v1  ;;  %v243_v7 = vpack.c.bf16 %v1774_v4, %v1769_v2  ;;  %v1785_v8 = vld [vmem:[%s1760_s18 + $0xc8] sm:$0xff]  ;;  %v1788_v9 = vld [vmem:[%s1760_s18 + $0xd8] sm:$0xff]  ;;  %v240_v10 = vpack.c.bf16 %v1780_v6, %v1777_v5  ;;  %v1795_v12 = vld [vmem:[%s1760_s18 + $0xa0] sm:$0xff] }
  0x14   : > { %2835 = vst [vmem:[#allocation4_spill] sm:$0xff] %v1769_v2  ;;  %292 = vmatpush.bf16.msra.mxu0 %v242_v3  ;;  %v241_v11 = vpack.c.bf16 %v1788_v9, %v1785_v8  ;;  %v1798_v13 = vld [vmem:[%s1760_s18 + $0xb0] sm:$0xff]  ;;  %v1801_v14 = vld [vmem:[%s1760_s18 + $0xa8] sm:$0xff]  ;;  %v1804_v15 = vld [vmem:[%s1760_s18 + $0xb8] sm:$0xff] }
  0x15   : > { %2836 = vst [vmem:[#allocation5_spill] sm:$0xff] %v1774_v4  ;;  %341 = vmatpush.bf16.msra.mxu1 %v243_v7  ;;  %v238_v16 = vpack.c.bf16 %v1798_v13, %v1795_v12  ;;  %v239_v17 = vpack.c.bf16 %v1804_v15, %v1801_v14  ;;  %v1811_v18 = vld [vmem:[%s1760_s18 + $0x80] sm:$0xff]  ;;  %v1814_v19 = vld [vmem:[%s1760_s18 + $0x90] sm:$0xff]  ;;  %v1817_v20 = vld [vmem:[%s1760_s18 + $0x88] sm:$0xff] }
  0x16   : > { %2837 = vst [vmem:[#allocation6_spill] sm:$0xff] %v1777_v5  ;;  %v1820_v21 = vld [vmem:[%s1760_s18 + $0x98] sm:$0xff]  ;;  %v236_v22 = vpack.c.bf16 %v1814_v19, %v1811_v18  ;;  %v1827_v24 = vld [vmem:[%s1760_s18 + $0x60] sm:$0xff]  ;;  %v1830_v25 = vld [vmem:[%s1760_s18 + $0x70] sm:$0xff] }
  0x17   : > { %2838 = vst [vmem:[#allocation7_spill] sm:$0xff] %v1780_v6  ;;  %v237_v23 = vpack.c.bf16 %v1820_v21, %v1817_v20  ;;  %v1833_v26 = vld [vmem:[%s1760_s18 + $0x68] sm:$0xff]  ;;  %v1836_v27 = vld [vmem:[%s1760_s18 + $0x78] sm:$0xff]  ;;  %v234_v28 = vpack.c.bf16 %v1830_v25, %v1827_v24  ;;  %v1843_v30 = vld [vmem:[%s1760_s18 + $0x40] sm:$0xff] }
  0x18   : > { %2839 = vst [vmem:[#allocation8_spill] sm:$0xff] %v1785_v8  ;;  %293 = vmatpush.bf16.msra.mxu0 %v240_v10  ;;  %v235_v29 = vpack.c.bf16 %v1836_v27, %v1833_v26  ;;  %v1846_v31 = vld [vmem:[%s1760_s18 + $0x50] sm:$0xff]  ;;  %v1849_v32 = vld [vmem:[%s1760_s18 + $0x48] sm:$0xff]  ;;  %v1852_v33 = vld [vmem:[%s1760_s18 + $0x58] sm:$0xff] }
  0x19   : > { %2840 = vst [vmem:[#allocation9_spill] sm:$0xff] %v1788_v9  ;;  %342 = vmatpush.bf16.msra.mxu1 %v241_v11  ;;  %v232_v34 = vpack.c.bf16 %v1846_v31, %v1843_v30  ;;  %v233_v35 = vpack.c.bf16 %v1852_v33, %v1849_v32  ;;  %v1859_v36 = vld [vmem:[%s1760_s18 + $0x20] sm:$0xff]  ;;  %v1862_v37 = vld [vmem:[%s1760_s18 + $0x30] sm:$0xff]  ;;  %v1865_v38 = vld [vmem:[%s1760_s18 + $0x28] sm:$0xff] }
  0x1a   : > { %2841 = vst [vmem:[#allocation10_spill] sm:$0xff] %v1795_v12  ;;  %v1868_v39 = vld [vmem:[%s1760_s18 + $0x38] sm:$0xff]  ;;  %v230_v40 = vpack.c.bf16 %v1862_v37, %v1859_v36  ;;  %v1875_v42 = vld [vmem:[%s1760_s18] sm:$0xff]  ;;  %v1878_v43 = vld [vmem:[%s1760_s18 + $0x10] sm:$0xff] }
  0x1b   : > { %2842 = vst [vmem:[#allocation11_spill] sm:$0xff] %v1798_v13  ;;  %v231_v41 = vpack.c.bf16 %v1868_v39, %v1865_v38  ;;  %v1881_v44 = vld [vmem:[%s1760_s18 + $0x8] sm:$0xff]  ;;  %v1884_v45 = vld [vmem:[%s1760_s18 + $0x18] sm:$0xff]  ;;  %v228_v46 = vpack.c.bf16 %v1878_v43, %v1875_v42 }
  0x1c   : > { %2843 = vst [vmem:[#allocation12_spill] sm:$0xff] %v1801_v14  ;;  %294 = vmatpush.bf16.msra.mxu0 %v238_v16  ;;  %v229_v47 = vpack.c.bf16 %v1884_v45, %v1881_v44 }
  0x1d   : > { %2844 = vst [vmem:[#allocation13_spill] sm:$0xff] %v1804_v15  ;;  %343 = vmatpush.bf16.msra.mxu1 %v239_v17 }
  0x1e   : > { %2845 = vst [vmem:[#allocation14_spill] sm:$0xff] %v1814_v19 }
  0x1f   : > { %2846 = vst [vmem:[#allocation15_spill] sm:$0xff] %v1817_v20 }
  0x20   : > { %2847 = vst [vmem:[#allocation16_spill] sm:$0xff] %v1820_v21  ;;  %295 = vmatpush.bf16.msra.mxu0 %v236_v22 }
  0x21   : > { %2848 = vst [vmem:[#allocation17_spill] sm:$0xff] %v1833_v26  ;;  %344 = vmatpush.bf16.msra.mxu1 %v237_v23 }
  0x22   : > { %2849 = vst [vmem:[#allocation18_spill] sm:$0xff] %v1836_v27 }
  0x23   : > { %2850 = vst [vmem:[#allocation19_spill] sm:$0xff] %v1849_v32 }
  0x24   : > { %2851 = vst [vmem:[#allocation20_spill] sm:$0xff] %v1852_v33  ;;  %296 = vmatpush.bf16.msra.mxu0 %v234_v28 }
  0x25   : > { %345 = vmatpush.bf16.msra.mxu1 %v235_v29  ;;  %2852 = vst [vmem:[#allocation21_spill] sm:$0xff] %v1865_v38 }
  0x26   : > { %2853 = vst [vmem:[#allocation22_spill] sm:$0xff] %v1868_v39 }
  0x27   : > { %2854 = vst [vmem:[#allocation23_spill] sm:$0xff] %v1881_v44 }
  0x28   : > { %297 = vmatpush.bf16.msra.mxu0 %v232_v34  ;;  %2855 = vst [vmem:[#allocation24_spill] sm:$0xff] %v1884_v45 }
  0x29   : > { %346 = vmatpush.bf16.msra.mxu1 %v233_v35 }
  0x2c   : > { %298 = vmatpush.bf16.msra.mxu0 %v230_v40 }
  0x2d   : > { %347 = vmatpush.bf16.msra.mxu1 %v231_v41 }
  0x30   : > { %299 = vmatpush.bf16.msra.mxu0 %v228_v46 }
  0x31   : > { %348 = vmatpush.bf16.msra.mxu1 %v229_v47 }
  0x33   : > { %300 = vmatmul.bf16.vlgmr.msra.gmra.mxu0 %v1893_v48 }
  0x34   : > { %349 = vmatmul.bf16.vlgmr.msra.gmra.mxu1 %v1893_v48 }
  0x43   : > { %305 = vmatmul.bf16.gmra.mxu0 %v1900_v49 }
  0x44   : > { %354 = vmatmul.bf16.gmra.mxu1 %v1900_v49 }
  0x53   : > { %310 = vmatmul.bf16.gmra.mxu0 %v1907_v50 }
  0x54   : > { %359 = vmatmul.bf16.gmra.mxu1 %v1907_v50 }
  0x63   : > { %315 = vmatmul.bf16.gmra.mxu0 %v1914_v51 }
  0x64   : > { %364 = vmatmul.bf16.gmra.mxu1 %v1914_v51 }
  0x73   : > { %320 = vmatmul.bf16.gmra.mxu0 %v1921_v52 }
  0x74   : > { %369 = vmatmul.bf16.gmra.mxu1 %v1921_v52 }
  0x83   : > { %325 = vmatmul.bf16.gmra.mxu0 %v1928_v53 }
  0x84   : > { %374 = vmatmul.bf16.gmra.mxu1 %v1928_v53 }
  0x93   : > { %330 = vmatmul.bf16.gmra.mxu0 %v1935_v54 }
  0x94   : > { %379 = vmatmul.bf16.gmra.mxu1 %v1935_v54 }
  0xa3   : > { %335 = vmatmul.bf16.gmra.mxu0 %v1942_v55 }
  0xa4   : > { %384 = vmatmul.bf16.gmra.mxu1 %v1942_v55 }
  0xb0   : > { %v1946_v56 = vpop.f32.mrf.mxu0 }
  0xb1   : > { %v1948_v57 = vpop.f32.mrf.mxu1 }
  0xb8   : > { %v1950_v58 = vpop.f32.mrf.mxu0 }
  0xb9   : > { %v1952_v59 = vpop.f32.mrf.mxu1 }
  0xc0   : > { %v1954_v60 = vpop.f32.mrf.mxu0 }
  0xc1   : > { %v1956_v61 = vpop.f32.mrf.mxu1 }
  0xc8   : > { %v1958_v62 = vpop.f32.mrf.mxu0 }
  0xc9   : > { %v1960_v63 = vpop.f32.mrf.mxu1 }
  0xd0   : > { %v1962_v3 = vpop.f32.mrf.mxu0 }
  0xd1   : > { %v1964_v7 = vpop.f32.mrf.mxu1 }
  0xd8   : > { %v1966_v10 = vpop.f32.mrf.mxu0 }
  0xd9   : > { %v1968_v11 = vpop.f32.mrf.mxu1 }
  0xe0   : > { %v316_v16 = vpop.f32.mrf.mxu0 }
  0xe1   : > { %v365_v17 = vpop.f32.mrf.mxu1 }
  0xe8   : > { %v318_v22 = vpop.f32.mrf.mxu0 }
  0xe9   : > { %v367_v23 = vpop.f32.mrf.mxu1 }
  0xf0   : > { %v321_v28 = vpop.f32.mrf.mxu0 }
  0xf1   : > { %v370_v29 = vpop.f32.mrf.mxu1 }
  0xf8   : > { %v323_v34 = vpop.f32.mrf.mxu0 }
  0xf9   : > { %v372_v35 = vpop.f32.mrf.mxu1 }
 0x100   : > { %v326_v40 = vpop.f32.mrf.mxu0 }
 0x101   : > { %v375_v41 = vpop.f32.mrf.mxu1  ;;  %v410_v12 = vmax.f32 %v326_v40, 0.0 }
 0x102   : > { %v411_v19 = vmax.f32 %v375_v41, 0.0  ;;  %v2020_v41 = vld [vmem:[%s1760_s18 + $0x1a0] sm:$0xff] }
 0x103   : > { %2865 = vst [vmem:[#allocation34_spill] sm:$0xff] %v2020_v41 }
 0x108   : > { %v328_v46 = vpop.f32.mrf.mxu0 }
 0x109   : > { %v377_v47 = vpop.f32.mrf.mxu1  ;;  %v412_v6 = vmax.f32 %v328_v46, 0.0  ;;  %v2023_v46 = vld [vmem:[%s1760_s18 + $0x1b0] sm:$0xff] }
 0x10a   : > { %v413_v13 = vmax.f32 %v377_v47, 0.0  ;;  %2866 = vst [vmem:[#allocation35_spill] sm:$0xff] %v2023_v46  ;;  %v2027_v47 = vld [vmem:[%s1760_s18 + $0x1a8] sm:$0xff] }
 0x10b   : > { %2867 = vst [vmem:[#allocation36_spill] sm:$0xff] %v2027_v47 }
 0x110   : > { %v331_v4 = vpop.f32.mrf.mxu0 }
 0x111   : > { %v380_v2 = vpop.f32.mrf.mxu1  ;;  %v414_v1 = vmax.f32 %v331_v4, 0.0  ;;  %v404_v4 = vmax.f32 %v318_v22, 0.0 }
 0x112   : > { %v415_v0 = vmax.f32 %v380_v2, 0.0  ;;  %v405_v2 = vmax.f32 %v367_v23, 0.0  ;;  %v1999_v23 = vld [vmem:[%s1760_s18 + $0x1c0] sm:$0xff] }
 0x113   : > { %2861 = vst [vmem:[#allocation30_spill] sm:$0xff] %v1999_v23 }
 0x118   : > { %v333_v9 = vpop.f32.mrf.mxu0 }
 0x119   : > { %v382_v8 = vpop.f32.mrf.mxu1  ;;  %v416_v39 = vmax.f32 %v333_v9, 0.0  ;;  %v406_v9 = vmax.f32 %v321_v28, 0.0  ;;  %v2002_v28 = vld [vmem:[%s1760_s18 + $0x1d0] sm:$0xff] }
 0x11a   : > { %v417_v45 = vmax.f32 %v382_v8, 0.0  ;;  %v407_v8 = vmax.f32 %v370_v29, 0.0  ;;  %2862 = vst [vmem:[#allocation31_spill] sm:$0xff] %v2002_v28  ;;  %v2005_v29 = vld [vmem:[%s1760_s18 + $0x1c8] sm:$0xff] }
 0x11b   : > { %v434_v5 = vpack.c.bf16 %v416_v39, %v414_v1  ;;  %v403_v1 = vmax.f32 %v365_v17, 0.0  ;;  %v397_v39 = vmax.f32 %v1960_v63, 0.0  ;;  %2863 = vst [vmem:[#allocation32_spill] sm:$0xff] %v2005_v29 }
 0x11c   : > { %v435_v55 = vpack.c.bf16 %v417_v45, %v415_v0  ;;  %v400_v0 = vmax.f32 %v1966_v10, 0.0  ;;  %v394_v45 = vmax.f32 %v1954_v60, 0.0  ;;  %v1980_v10 = vld [vmem:[%s1760_s18 + $0x1e0] sm:$0xff]  ;;  %v1990_v60 = vld [vmem:[%s1760_s18 + $0x1f8] sm:$0xff] }
 0x11d   : > { %2857 = vst [vmem:[#allocation26_spill] sm:$0xff] %v1980_v10 }
 0x11e   : > { %2860 = vst [vmem:[#allocation29_spill] sm:$0xff] %v1990_v60 }
 0x120   : > { %v336_v15 = vpop.f32.mrf.mxu0 }
 0x121   : > { %v385_v14 = vpop.f32.mrf.mxu1  ;;  %v418_v20 = vmax.f32 %v336_v15, 0.0  ;;  %v408_v15 = vmax.f32 %v323_v34, 0.0  ;;  %v2013_v34 = vld [vmem:[%s2764_s2] sm:$0xf] }
 0x122   : > { %v419_v33 = vmax.f32 %v385_v14, 0.0  ;;  %v409_v14 = vmax.f32 %v372_v35, 0.0  ;;  %v575_v35 = vpack.c.bf16 %v2002_v28, %v1999_v23 }
 0x128   : > { %v338_v21 = vpop.f32.mrf.mxu0 }
 0x129   : > { %v420_v27 = vmax.f32 %v338_v21, 0.0  ;;  %v387_v26 = vpop.f32.mrf.mxu1  ;;  %v432_v21 = vpack.c.bf16 %v412_v6, %v410_v12  ;;  %v429_v6 = vpack.c.bf16 %v405_v2, %v403_v1  ;;  %v398_v12 = vmax.f32 %v1962_v3, 0.0  ;;  %v2060_v1 = vld [vmem:[%s1760_s18 + $0x168] sm:$0xff] }
 0x12a   : > { %v421_v32 = vmax.f32 %v387_v26, 0.0  ;;  %v433_v26 = vpack.c.bf16 %v413_v13, %v411_v19  ;;  %v399_v13 = vmax.f32 %v1964_v7, 0.0  ;;  %v396_v19 = vmax.f32 %v1958_v62, 0.0  ;;  %2873 = vst [vmem:[#allocation42_spill] sm:$0xff] %v2060_v1 }
 0x12b   : > { %v436_v38 = vpack.c.bf16 %v420_v27, %v418_v20  ;;  %v430_v20 = vpack.c.bf16 %v408_v15, %v406_v9  ;;  %v431_v27 = vpack.c.bf16 %v409_v14, %v407_v8  ;;  %v392_v3 = vmax.f32 %v1950_v58, 0.0  ;;  %v2030_v15 = vld [vmem:[%s1760_s18 + $0x1b8] sm:$0xff]  ;;  %v2041_v9 = vld [vmem:[%s1760_s18 + $0x190] sm:$0xff]  ;;  %v2044_v8 = vld [vmem:[%s1760_s18 + $0x188] sm:$0xff] }
 0x12c   : > { %v437_v44 = vpack.c.bf16 %v421_v32, %v419_v33  ;;  %v402_v32 = vmax.f32 %v316_v16, 0.0  ;;  %v401_v33 = vmax.f32 %v1968_v11, 0.0  ;;  %v424_v7 = vpack.c.bf16 %v396_v19, %v394_v45  ;;  %v1983_v11 = vld [vmem:[%s1760_s18 + $0x1f0] sm:$0xff]  ;;  %v1987_v16 = vld [vmem:[%s1760_s18 + $0x1e8] sm:$0xff]  ;;  %2868 = vst [vmem:[#allocation37_spill] sm:$0xff] %v2030_v15  ;;  %v2079_v19 = vld [vmem:[%s1760_s18 + $0x158] sm:$0xff] }
 0x12d   : > { %438 = vmatpush.bf16.msra.mxu2 %v436_v38  ;;  %v426_v38 = vpack.c.bf16 %v400_v0, %v398_v12  ;;  %2858 = vst [vmem:[#allocation27_spill] sm:$0xff] %v1983_v11  ;;  %v393_v62 = vmax.f32 %v1952_v59, 0.0  ;;  %v391_v58 = vmax.f32 %v1948_v57, 0.0  ;;  %v577_v17 = vpack.c.bf16 %v1983_v11, %v1980_v10  ;;  %v2008_v57 = vld [vmem:[%s1760_s18 + $0x1d8] sm:$0xff]  ;;  %v2073_v12 = vld [vmem:[%s1760_s18 + $0x150] sm:$0xff] }
 0x12e   : > { %451 = vmatpush.bf16.msra.mxu3 %v437_v44  ;;  %v427_v44 = vpack.c.bf16 %v401_v33, %v399_v13  ;;  %2859 = vst [vmem:[#allocation28_spill] sm:$0xff] %v1987_v16  ;;  %v578_v59 = vpack.c.bf16 %v1990_v60, %v1987_v16  ;;  %v576_v40 = vpack.c.bf16 %v2008_v57, %v2005_v29  ;;  %v2063_v0 = vld [vmem:[%s1760_s18 + $0x178] sm:$0xff]  ;;  %v2076_v13 = vld [vmem:[%s1760_s18 + $0x148] sm:$0xff]  ;;  %v2089_v45 = vld [vmem:[%s1760_s18 + $0x130] sm:$0xff] }
 0x12f   : > { %2864 = vst [vmem:[#allocation33_spill] sm:$0xff] %v2008_v57  ;;  %v574_v14 = vpack.c.bf16 %v2030_v15, %v2027_v47  ;;  %v570_v33 = vpack.c.bf16 %v2063_v0, %v2060_v1 }
 0x130   : > { %2870 = vst [vmem:[#allocation39_spill] sm:$0xff] %v2041_v9 }
 0x131   : > { %439 = vmatpush.bf16.msra.mxu2 %v434_v5  ;;  %v428_v5 = vpack.c.bf16 %v404_v4, %v402_v32  ;;  %2871 = vst [vmem:[#allocation40_spill] sm:$0xff] %v2044_v8  ;;  %v2047_v4 = vld [vmem:[%s1760_s18 + $0x198] sm:$0xff]  ;;  %v2057_v32 = vld [vmem:[%s1760_s18 + $0x170] sm:$0xff] }
 0x132   : > { %452 = vmatpush.bf16.msra.mxu3 %v435_v55  ;;  %v395_v55 = vmax.f32 %v1956_v61, 0.0  ;;  %v390_v61 = vmax.f32 %v1946_v56, 0.0  ;;  %v423_v56 = vpack.c.bf16 %v393_v62, %v391_v58  ;;  %2872 = vst [vmem:[#allocation41_spill] sm:$0xff] %v2047_v4  ;;  %v572_v2 = vpack.c.bf16 %v2047_v4, %v2044_v8  ;;  %v2108_v58 = vld [vmem:[%s1760_s18 + $0x108] sm:$0xff] }
 0x133   : > { %2874 = vst [vmem:[#allocation43_spill] sm:$0xff] %v2063_v0 }
 0x134   : > { %v425_v63 = vpack.c.bf16 %v397_v39, %v395_v55  ;;  %v422_v22 = vpack.c.bf16 %v392_v3, %v390_v61  ;;  %2875 = vst [vmem:[#allocation44_spill] sm:$0xff] %v2076_v13  ;;  %v568_v39 = vpack.c.bf16 %v2079_v19, %v2076_v13  ;;  %v2092_v55 = vld [vmem:[%s1760_s18 + $0x128] sm:$0xff]  ;;  %v2095_v3 = vld [vmem:[%s1760_s18 + $0x138] sm:$0xff]  ;;  %v2105_v61 = vld [vmem:[%s1760_s18 + $0x110] sm:$0xff] }
 0x135   : > { %440 = vmatpush.bf16.msra.mxu2 %v432_v21  ;;  %v573_v21 = vpack.c.bf16 %v2023_v46, %v2020_v41  ;;  %2876 = vst [vmem:[#allocation45_spill] sm:$0xff] %v2079_v19  ;;  %v566_v62 = vpack.c.bf16 %v2095_v3, %v2092_v55 }
 0x136   : > { %453 = vmatpush.bf16.msra.mxu3 %v433_v26  ;;  %v2038_v26 = vld [vmem:[%s1760_s18 + $0x180] sm:$0xff]  ;;  %2877 = vst [vmem:[#allocation46_spill] sm:$0xff] %v2092_v55 }
 0x137   : > { %2869 = vst [vmem:[#allocation38_spill] sm:$0xff] %v2038_v26 }
 0x138   : > { %2878 = vst [vmem:[#allocation47_spill] sm:$0xff] %v2095_v3 }
 0x139   : > { %441 = vmatpush.bf16.msra.mxu2 %v430_v20  ;;  %v571_v20 = vpack.c.bf16 %v2041_v9, %v2038_v26  ;;  %2879 = vst [vmem:[#allocation48_spill] sm:$0xff] %v2108_v58 }
 0x13a   : > { %454 = vmatpush.bf16.msra.mxu3 %v431_v27  ;;  %v2054_v27 = vld [vmem:[%s1760_s18 + $0x160] sm:$0xff] }
 0x13d   : > { %442 = vmatpush.bf16.msra.mxu2 %v428_v5  ;;  %v569_v5 = vpack.c.bf16 %v2057_v32, %v2054_v27 }
 0x13e   : > { %455 = vmatpush.bf16.msra.mxu3 %v429_v6  ;;  %v2070_v6 = vld [vmem:[%s1760_s18 + $0x140] sm:$0xff] }
 0x141   : > { %443 = vmatpush.bf16.msra.mxu2 %v426_v38  ;;  %v567_v38 = vpack.c.bf16 %v2073_v12, %v2070_v6 }
 0x142   : > { %456 = vmatpush.bf16.msra.mxu3 %v427_v44  ;;  %v2086_v44 = vld [vmem:[%s1760_s18 + $0x120] sm:$0xff] }
 0x145   : > { %444 = vmatpush.bf16.msra.mxu2 %v424_v7  ;;  %v565_v7 = vpack.c.bf16 %v2089_v45, %v2086_v44 }
 0x146   : > { %457 = vmatpush.bf16.msra.mxu3 %v425_v63  ;;  %v2102_v63 = vld [vmem:[%s1760_s18 + $0x100] sm:$0xff] }
 0x149   : > { %445 = vmatpush.bf16.msra.mxu2 %v422_v22  ;;  %v563_v22 = vpack.c.bf16 %v2105_v61, %v2102_v63 }
 0x14a   : > { %458 = vmatpush.bf16.msra.mxu3 %v423_v56 }
 0x14c   : > { %446 = vmatmul.bf16.vlgmr.msra.gmra.mxu2 %v2013_v34 }
 0x14d   : > { %579 = vmatpush.bf16.msrb.mxu2 %v577_v17  ;;  %459 = vmatmul.bf16.vlgmr.msra.gmra.mxu3 %v2013_v34  ;;  %v2111_v17 = vld [vmem:[%s1760_s18 + $0x118] sm:$0xff] }
 0x14e   : > { %628 = vmatpush.bf16.msrb.mxu3 %v578_v59  ;;  %2880 = vst [vmem:[#allocation49_spill] sm:$0xff] %v2111_v17  ;;  %v564_v59 = vpack.c.bf16 %v2111_v17, %v2108_v58 }
 0x151   : > { %580 = vmatpush.bf16.msrb.mxu2 %v575_v35 }
 0x152   : > { %629 = vmatpush.bf16.msrb.mxu3 %v576_v40 }
 0x155   : > { %581 = vmatpush.bf16.msrb.mxu2 %v573_v21 }
 0x156   : > { %630 = vmatpush.bf16.msrb.mxu3 %v574_v14 }
 0x159   : > { %582 = vmatpush.bf16.msrb.mxu2 %v571_v20 }
 0x15a   : > { %631 = vmatpush.bf16.msrb.mxu3 %v572_v2 }
 0x15d   : > { %583 = vmatpush.bf16.msrb.mxu2 %v569_v5 }
 0x15e   : > { %632 = vmatpush.bf16.msrb.mxu3 %v570_v33 }
 0x161   : > { %584 = vmatpush.bf16.msrb.mxu2 %v567_v38 }
 0x162   : > { %633 = vmatpush.bf16.msrb.mxu3 %v568_v39 }
 0x165   : > { %585 = vmatpush.bf16.msrb.mxu2 %v565_v7 }
 0x166   : > { %634 = vmatpush.bf16.msrb.mxu3 %v566_v62 }
 0x169   : > { %586 = vmatpush.bf16.msrb.mxu2 %v563_v22 }
 0x16a   : > { %635 = vmatpush.bf16.msrb.mxu3 %v564_v59 }
 0x16c   : > { %587 = vmatmul.bf16.vlgmr.msrb.gmra.mxu2 %v1893_v48 }
 0x16d   : > { %636 = vmatmul.bf16.vlgmr.msrb.gmra.mxu3 %v1893_v48 }
 0x17c   : > { %592 = vmatmul.bf16.gmra.mxu2 %v1900_v49 }
 0x17d   : > { %641 = vmatmul.bf16.gmra.mxu3 %v1900_v49 }
 0x18c   : > { %597 = vmatmul.bf16.gmra.mxu2 %v1907_v50 }
 0x18d   : > { %646 = vmatmul.bf16.gmra.mxu3 %v1907_v50 }
 0x19c   : > { %602 = vmatmul.bf16.gmra.mxu2 %v1914_v51 }
 0x19d   : > { %651 = vmatmul.bf16.gmra.mxu3 %v1914_v51 }
 0x1ac   : > { %607 = vmatmul.bf16.gmra.mxu2 %v1921_v52 }
 0x1ad   : > { %656 = vmatmul.bf16.gmra.mxu3 %v1921_v52 }
 0x1bc   : > { %612 = vmatmul.bf16.gmra.mxu2 %v1928_v53 }
 0x1bd   : > { %661 = vmatmul.bf16.gmra.mxu3 %v1928_v53 }
 0x1cc   : > { %617 = vmatmul.bf16.gmra.mxu2 %v1935_v54 }
 0x1cd   : > { %666 = vmatmul.bf16.gmra.mxu3 %v1935_v54 }
 0x1cf   : > { %v447_v56 = vpop.f32.mrf.mxu2 }
 0x1d0   : > { %v464_v35 = vperm.slane %v447_v56, 0  ;;  %v460_v40 = vpop.f32.mrf.mxu3  ;;  %v2886_v56 = vld [vmem:[#allocation7_spill] sm:$0xff] }
 0x1d1   : > { %v465_v59 = vperm.slane %v460_v40, 0 }
 0x1d2   : > { %v466_v21 = vmul.f32 %v464_v35, %v1875_v42  ;;  %v468_v14 = vmul.f32 %v464_v35, %v1878_v43  ;;  %v470_v20 = vmul.f32 %v464_v35, %v1859_v36  ;;  %v472_v2 = vmul.f32 %v464_v35, %v1862_v37 }
 0x1d3   : > { %v474_v5 = vmul.f32 %v464_v35, %v1843_v30  ;;  %v476_v33 = vmul.f32 %v464_v35, %v1846_v31  ;;  %v478_v38 = vmul.f32 %v464_v35, %v1827_v24  ;;  %v480_v42 = vmul.f32 %v464_v35, %v1830_v25  ;;  %v2881_v30 = vld [vmem:[#allocation14_spill] sm:$0xff]  ;;  %v2883_v24 = vld [vmem:[#allocation25_spill] sm:$0xff]  ;;  %v2884_v25 = vld [vmem:[#allocation11_spill] sm:$0xff] }
 0x1d4   : > { %498 = vst [vmem:[%s2136_s13] sm:$0xff] %v466_v21  ;;  %v482_v36 = vmul.f32 %v464_v35, %v1811_v18  ;;  %v484_v39 = vmul.f32 %v464_v35, %v2881_v30  ;;  %v2882_v31 = vld [vmem:[#allocation10_spill] sm:$0xff]  ;;  %v488_v62 = vmul.f32 %v464_v35, %v2884_v25  ;;  %v492_v21 = vmul.f32 %v464_v35, %v2886_v56  ;;  %v2895_v25 = vld [vmem:[#allocation17_spill] sm:$0xff]  ;;  %v2897_v56 = vld [vmem:[#allocation15_spill] sm:$0xff] }
 0x1d5   : > { %500 = vst [vmem:[%s2136_s13 + $0x10] sm:$0xff] %v468_v14  ;;  %v486_v7 = vmul.f32 %v464_v35, %v2882_v31  ;;  %v2885_v18 = vld [vmem:[#allocation6_spill] sm:$0xff]  ;;  %v2894_v31 = vld [vmem:[#allocation20_spill] sm:$0xff] }
 0x1d6   : > { %502 = vst [vmem:[%s2136_s13 + $0x20] sm:$0xff] %v470_v20  ;;  %v490_v22 = vmul.f32 %v464_v35, %v2885_v18  ;;  %v2887_v14 = vld [vmem:[#allocation2_spill] sm:$0xff] }
 0x1d7   : > { %504 = vst [vmem:[%s2136_s13 + $0x30] sm:$0xff] %v472_v2  ;;  %v449_v43 = vpop.f32.mrf.mxu2  ;;  %v494_v20 = vmul.f32 %v464_v35, %v2887_v14  ;;  %v2888_v2 = vld [vmem:[#allocation3_spill] sm:$0xff]  ;;  %v2896_v18 = vld [vmem:[#allocation18_spill] sm:$0xff]  ;;  %v2898_v14 = vld [vmem:[#allocation16_spill] sm:$0xff] }
 0x1d8   : > { %506 = vst [vmem:[%s2136_s13 + $0x40] sm:$0xff] %v474_v5  ;;  %v462_v37 = vpop.f32.mrf.mxu3  ;;  %v496_v5 = vmul.f32 %v464_v35, %v2888_v2  ;;  %v2891_v43 = vld [vmem:[#allocation21_spill] sm:$0xff]  ;;  %v2899_v2 = vld [vmem:[#allocation12_spill] sm:$0xff] }
 0x1d9   : > { %508 = vst [vmem:[%s2136_s13 + $0x50] sm:$0xff] %v476_v33  ;;  %v2889_v33 = vld [vmem:[#allocation23_spill] sm:$0xff]  ;;  %v2892_v37 = vld [vmem:[#allocation22_spill] sm:$0xff] }
 0x1da   : > { %510 = vst [vmem:[%s2136_s13 + $0x60] sm:$0xff] %v478_v38  ;;  %v467_v38 = vmul.f32 %v465_v59, %v2889_v33  ;;  %v473_v30 = vmul.f32 %v465_v59, %v2892_v37  ;;  %v2900_v33 = vld [vmem:[#allocation13_spill] sm:$0xff] }
 0x1db   : > { %512 = vst [vmem:[%s2136_s13 + $0x70] sm:$0xff] %v480_v42  ;;  %v2890_v42 = vld [vmem:[#allocation24_spill] sm:$0xff] }
 0x1dc   : > { %622 = vmatmul.bf16.gmra.mxu2 %v2883_v24  ;;  %514 = vst [vmem:[%s2136_s13 + $0x80] sm:$0xff] %v482_v36  ;;  %v469_v40 = vmul.f32 %v465_v59, %v2890_v42  ;;  %v471_v36 = vmul.f32 %v465_v59, %v2891_v43  ;;  %v2901_v42 = vld [vmem:[#allocation8_spill] sm:$0xff] }
 0x1dd   : > { %671 = vmatmul.bf16.gmra.mxu3 %v2883_v24  ;;  %516 = vst [vmem:[%s2136_s13 + $0x90] sm:$0xff] %v484_v39  ;;  %v2893_v39 = vld [vmem:[#allocation19_spill] sm:$0xff] }
 0x1de   : > { %518 = vst [vmem:[%s2136_s13 + $0xa0] sm:$0xff] %v486_v7  ;;  %v475_v35 = vmul.f32 %v465_v59, %v2893_v39  ;;  %v477_v7 = vmul.f32 %v465_v59, %v2894_v31  ;;  %v2903_v39 = vld [vmem:[#allocation4_spill] sm:$0xff]  ;;  %v2904_v31 = vld [vmem:[#allocation5_spill] sm:$0xff] }
 0x1df   : > { %520 = vst [vmem:[%s2136_s13 + $0xb0] sm:$0xff] %v488_v62  ;;  %v479_v62 = vmul.f32 %v465_v59, %v2895_v25 }
 0x1e0   : > { %522 = vst [vmem:[%s2136_s13 + $0xc0] sm:$0xff] %v490_v22  ;;  %v481_v22 = vmul.f32 %v465_v59, %v2896_v18 }
 0x1e1   : > { %524 = vst [vmem:[%s2136_s13 + $0xd0] sm:$0xff] %v492_v21  ;;  %v483_v21 = vmul.f32 %v465_v59, %v2897_v56 }
 0x1e2   : > { %526 = vst [vmem:[%s2136_s13 + $0xe0] sm:$0xff] %v494_v20  ;;  %v485_v20 = vmul.f32 %v465_v59, %v2898_v14 }
 0x1e3   : > { %528 = vst [vmem:[%s2136_s13 + $0xf0] sm:$0xff] %v496_v5  ;;  %v487_v5 = vmul.f32 %v465_v59, %v2899_v2 }
 0x1e4   : > { %499 = vst [vmem:[%s2136_s13 + $0x8] sm:$0xff] %v467_v38  ;;  %v489_v38 = vmul.f32 %v465_v59, %v2900_v33 }
 0x1e5   : > { %501 = vst [vmem:[%s2136_s13 + $0x18] sm:$0xff] %v469_v40  ;;  %v491_v40 = vmul.f32 %v465_v59, %v2901_v42 }
 0x1e6   : > { %503 = vst [vmem:[%s2136_s13 + $0x28] sm:$0xff] %v471_v36  ;;  %v2902_v36 = vld [vmem:[#allocation9_spill] sm:$0xff] }
 0x1e7   : > { %505 = vst [vmem:[%s2136_s13 + $0x38] sm:$0xff] %v473_v30  ;;  %v493_v37 = vmul.f32 %v465_v59, %v2902_v36 }
 0x1e8   : > { %507 = vst [vmem:[%s2136_s13 + $0x48] sm:$0xff] %v475_v35  ;;  %v495_v35 = vmul.f32 %v465_v59, %v2903_v39 }
 0x1e9   : > { %509 = vst [vmem:[%s2136_s13 + $0x58] sm:$0xff] %v477_v7  ;;  %v497_v7 = vmul.f32 %v465_v59, %v2904_v31 }
 0x1ea   : > { %511 = vst [vmem:[%s2136_s13 + $0x68] sm:$0xff] %v479_v62 }
 0x1eb   : > { %513 = vst [vmem:[%s2136_s13 + $0x78] sm:$0xff] %v481_v22 }
 0x1ec   : > { %515 = vst [vmem:[%s2136_s13 + $0x88] sm:$0xff] %v483_v21 }
 0x1ed   : > { %517 = vst [vmem:[%s2136_s13 + $0x98] sm:$0xff] %v485_v20 }
 0x1ee   : > { %519 = vst [vmem:[%s2136_s13 + $0xa8] sm:$0xff] %v487_v5 }
 0x1ef   : > { %v2194_v43 = vpop.f32.mrf.mxu2  ;;  %521 = vst [vmem:[%s2136_s13 + $0xb8] sm:$0xff] %v489_v38 }
 0x1f0   : > { %v2198_v30 = vpop.f32.mrf.mxu3  ;;  %523 = vst [vmem:[%s2136_s13 + $0xc8] sm:$0xff] %v491_v40 }
 0x1f1   : > { %525 = vst [vmem:[%s2136_s13 + $0xd8] sm:$0xff] %v493_v37 }
 0x1f2   : > { %527 = vst [vmem:[%s2136_s13 + $0xe8] sm:$0xff] %v495_v35 }
 0x1f3   : > { %529 = vst [vmem:[%s2136_s13 + $0xf8] sm:$0xff] %v497_v7 }
 0x1f7   : > { %v2208_v25 = vpop.f32.mrf.mxu2 }
 0x1f8   : > { %v2210_v62 = vpop.f32.mrf.mxu3 }
 0x1ff   : > { %v2212_v18 = vpop.f32.mrf.mxu2 }
 0x200   : > { %v2214_v22 = vpop.f32.mrf.mxu3 }
 0x207   : > { %v2216_v56 = vpop.f32.mrf.mxu2 }
 0x208   : > { %v2218_v21 = vpop.f32.mrf.mxu3 }
 0x20f   : > { %v2220_v14 = vpop.f32.mrf.mxu2 }
 0x210   : > { %v2222_v59 = vpop.f32.mrf.mxu3 }
 0x217   : > { %v2224_v20 = vpop.f32.mrf.mxu2 }
 0x218   : > { %v2226_v2 = vpop.f32.mrf.mxu3 }
 0x21f   : > { %v603_v5 = vpop.f32.mrf.mxu2 }
 0x220   : > { %v652_v33 = vpop.f32.mrf.mxu3 }
 0x227   : > { %v605_v38 = vpop.f32.mrf.mxu2 }
 0x228   : > { %v654_v42 = vpop.f32.mrf.mxu3 }
 0x22f   : > { %v608_v40 = vpop.f32.mrf.mxu2 }
 0x230   : > { %v657_v36 = vpop.f32.mrf.mxu3 }
 0x237   : > { %v610_v37 = vpop.f32.mrf.mxu2 }
 0x238   : > { %v659_v39 = vpop.f32.mrf.mxu3 }
 0x23f   : > { %v613_v35 = vpop.f32.mrf.mxu2 }
 0x240   : > { %v662_v31 = vpop.f32.mrf.mxu3  ;;  %v697_v9 = vmax.f32 %v613_v35, 0.0  ;;  %v2276_v35 = vld [vmem:[%s1760_s18 + $0x2b0] sm:$0xff] }
 0x241   : > { %v698_v26 = vmax.f32 %v662_v31, 0.0  ;;  %v2279_v31 = vld [vmem:[%s1760_s18 + $0x2a8] sm:$0xff] }
 0x242   : > { %2909 = vst [vmem:[#allocation7_spill] sm:$0xff] %v2279_v31 }
 0x247   : > { %v615_v7 = vpop.f32.mrf.mxu2 }
 0x248   : > { %v664_v60 = vpop.f32.mrf.mxu3  ;;  %v699_v28 = vmax.f32 %v615_v7, 0.0  ;;  %v2282_v7 = vld [vmem:[%s1760_s18 + $0x2b8] sm:$0xff] }
 0x249   : > { %v700_v23 = vmax.f32 %v664_v60, 0.0  ;;  %v690_v60 = vmax.f32 %v652_v33, 0.0  ;;  %v2257_v33 = vld [vmem:[%s1760_s18 + $0x2c0] sm:$0xff]  ;;  %2910 = vst [vmem:[#allocation2_spill] sm:$0xff] %v2282_v7 }
 0x24f   : > { %v618_v16 = vpop.f32.mrf.mxu2 }
 0x250   : > { %v667_v57 = vpop.f32.mrf.mxu3  ;;  %v701_v11 = vmax.f32 %v618_v16, 0.0  ;;  %v691_v16 = vmax.f32 %v605_v38, 0.0 }
 0x251   : > { %v702_v10 = vmax.f32 %v667_v57, 0.0  ;;  %v692_v57 = vmax.f32 %v654_v42, 0.0 }
 0x257   : > { %v620_v29 = vpop.f32.mrf.mxu2 }
 0x258   : > { %v669_v15 = vpop.f32.mrf.mxu3  ;;  %v703_v55 = vmax.f32 %v620_v29, 0.0  ;;  %v693_v29 = vmax.f32 %v608_v40, 0.0  ;;  %v2260_v40 = vld [vmem:[%s1760_s18 + $0x2d0] sm:$0xff] }
 0x259   : > { %v704_v17 = vmax.f32 %v669_v15, 0.0  ;;  %v694_v15 = vmax.f32 %v657_v36, 0.0  ;;  %v863_v36 = vpack.c.bf16 %v2260_v40, %v2257_v33 }
 0x25a   : > { %v721_v46 = vpack.c.bf16 %v703_v55, %v701_v11  ;;  %v688_v11 = vmax.f32 %v2226_v2, 0.0  ;;  %v2245_v2 = vld [vmem:[%s1760_s18 + $0x2e8] sm:$0xff] }
 0x25b   : > { %v722_v41 = vpack.c.bf16 %v704_v17, %v702_v10  ;;  %v687_v10 = vmax.f32 %v2224_v20, 0.0  ;;  %v682_v17 = vmax.f32 %v2214_v22, 0.0  ;;  %v2242_v20 = vld [vmem:[%s1760_s18 + $0x2f0] sm:$0xff]  ;;  %2905 = vst [vmem:[#allocation14_spill] sm:$0xff] %v2245_v2  ;;  %v677_v22 = vmax.f32 %v2194_v43, 0.0  ;;  %v2263_v43 = vld [vmem:[%s1760_s18 + $0x2c8] sm:$0xff] }
 0x25c   : > { %2907 = vst [vmem:[#allocation11_spill] sm:$0xff] %v2263_v43 }
 0x25f   : > { %v623_v47 = vpop.f32.mrf.mxu2 }
 0x260   : > { %v672_v4 = vpop.f32.mrf.mxu3  ;;  %v705_v1 = vmax.f32 %v623_v47, 0.0  ;;  %v695_v47 = vmax.f32 %v610_v37, 0.0 }
 0x261   : > { %v706_v19 = vmax.f32 %v672_v4, 0.0  ;;  %v696_v4 = vmax.f32 %v659_v39, 0.0  ;;  %v2273_v39 = vld [vmem:[%s1760_s18 + $0x2a0] sm:$0xff] }
 0x267   : > { %v625_v8 = vpop.f32.mrf.mxu2 }
 0x268   : > { %v674_v0 = vpop.f32.mrf.mxu3  ;;  %v707_v13 = vmax.f32 %v625_v8, 0.0  ;;  %v719_v8 = vpack.c.bf16 %v699_v28, %v697_v9  ;;  %v716_v28 = vpack.c.bf16 %v692_v57, %v690_v60  ;;  %v684_v9 = vmax.f32 %v2218_v21, 0.0  ;;  %v2316_v60 = vld [vmem:[%s1760_s18 + $0x278] sm:$0xff] }
 0x269   : > { %v708_v3 = vmax.f32 %v674_v0, 0.0  ;;  %v720_v0 = vpack.c.bf16 %v700_v23, %v698_v26  ;;  %v685_v23 = vmax.f32 %v2220_v14, 0.0  ;;  %v683_v26 = vmax.f32 %v2216_v56, 0.0  ;;  %2913 = vst [vmem:[#allocation24_spill] sm:$0xff] %v2316_v60 }
 0x26a   : > { %v723_v58 = vpack.c.bf16 %v707_v13, %v705_v1  ;;  %v717_v1 = vpack.c.bf16 %v695_v47, %v693_v29  ;;  %v718_v13 = vpack.c.bf16 %v696_v4, %v694_v15  ;;  %v679_v14 = vmax.f32 %v2208_v25, 0.0  ;;  %v2297_v29 = vld [vmem:[%s1760_s18 + $0x288] sm:$0xff]  ;;  %v2300_v15 = vld [vmem:[%s1760_s18 + $0x298] sm:$0xff] }
 0x26b   : > { %v724_v24 = vpack.c.bf16 %v708_v3, %v706_v19  ;;  %v689_v19 = vmax.f32 %v603_v5, 0.0  ;;  %v713_v55 = vpack.c.bf16 %v687_v10, %v685_v23  ;;  %v712_v21 = vpack.c.bf16 %v684_v9, %v682_v17  ;;  %2911 = vst [vmem:[#allocation3_spill] sm:$0xff] %v2297_v29  ;;  %v2329_v23 = vld [vmem:[%s1760_s18 + $0x248] sm:$0xff]  ;;  %v2348_v17 = vld [vmem:[%s1760_s18 + $0x238] sm:$0xff] }
 0x26c   : > { %725 = vmatpush.bf16.msrb.mxu0 %v723_v58  ;;  %v681_v58 = vmax.f32 %v2212_v18, 0.0  ;;  %v2248_v18 = vld [vmem:[%s1760_s18 + $0x2f8] sm:$0xff]  ;;  %v678_v5 = vmax.f32 %v2198_v30, 0.0  ;;  %v709_v38 = vpack.c.bf16 %v679_v14, %v677_v22  ;;  %v861_v47 = vpack.c.bf16 %v2276_v35, %v2273_v39  ;;  %2912 = vst [vmem:[#allocation23_spill] sm:$0xff] %v2300_v15  ;;  %v2361_v22 = vld [vmem:[%s1760_s18 + $0x208] sm:$0xff] }
 0x26d   : > { %738 = vmatpush.bf16.msrb.mxu1 %v724_v24  ;;  %v2237_v24 = vld [vmem:[%s1760_s18 + $0x2e0] sm:$0xff]  ;;  %2906 = vst [vmem:[#allocation10_spill] sm:$0xff] %v2248_v18  ;;  %v2266_v30 = vld [vmem:[%s1760_s18 + $0x2d8] sm:$0xff]  ;;  %v862_v4 = vpack.c.bf16 %v2282_v7, %v2279_v31  ;;  %v860_v57 = vpack.c.bf16 %v2300_v15, %v2297_v29 }
 0x26e   : > { %v711_v56 = vpack.c.bf16 %v683_v26, %v681_v58  ;;  %v865_v25 = vpack.c.bf16 %v2242_v20, %v2237_v24  ;;  %2908 = vst [vmem:[#allocation6_spill] sm:$0xff] %v2266_v30  ;;  %v864_v37 = vpack.c.bf16 %v2266_v30, %v2263_v43  ;;  %v2345_v58 = vld [vmem:[%s1760_s18 + $0x228] sm:$0xff] }
 0x270   : > { %726 = vmatpush.bf16.msrb.mxu0 %v721_v46  ;;  %v686_v46 = vmax.f32 %v2222_v59, 0.0  ;;  %v680_v59 = vmax.f32 %v2210_v62, 0.0  ;;  %v866_v62 = vpack.c.bf16 %v2248_v18, %v2245_v2 }
 0x271   : > { %739 = vmatpush.bf16.msrb.mxu1 %v722_v41  ;;  %v715_v41 = vpack.c.bf16 %v691_v16, %v689_v19  ;;  %v2313_v19 = vld [vmem:[%s1760_s18 + $0x268] sm:$0xff] }
 0x272   : > { %v714_v3 = vpack.c.bf16 %v688_v11, %v686_v46  ;;  %v710_v42 = vpack.c.bf16 %v680_v59, %v678_v5  ;;  %v858_v11 = vpack.c.bf16 %v2316_v60, %v2313_v19  ;;  %v2332_v46 = vld [vmem:[%s1760_s18 + $0x258] sm:$0xff]  ;;  %v854_v59 = vpack.c.bf16 %v2348_v17, %v2345_v58 }
 0x273   : > { %v856_v9 = vpack.c.bf16 %v2332_v46, %v2329_v23  ;;  %v2364_v5 = vld [vmem:[%s1760_s18 + $0x218] sm:$0xff] }
 0x274   : > { %727 = vmatpush.bf16.msrb.mxu0 %v719_v8  ;;  %v2291_v8 = vld [vmem:[%s1760_s18 + $0x280] sm:$0xff] }
 0x275   : > { %740 = vmatpush.bf16.msrb.mxu1 %v720_v0  ;;  %v2294_v0 = vld [vmem:[%s1760_s18 + $0x290] sm:$0xff] }
 0x276   : > { %v859_v16 = vpack.c.bf16 %v2294_v0, %v2291_v8 }
 0x278   : > { %728 = vmatpush.bf16.msrb.mxu0 %v717_v1  ;;  %v2307_v1 = vld [vmem:[%s1760_s18 + $0x260] sm:$0xff] }
 0x279   : > { %741 = vmatpush.bf16.msrb.mxu1 %v718_v13  ;;  %v2310_v13 = vld [vmem:[%s1760_s18 + $0x270] sm:$0xff] }
 0x27a   : > { %v857_v10 = vpack.c.bf16 %v2310_v13, %v2307_v1 }
 0x27c   : > { %729 = vmatpush.bf16.msrb.mxu0 %v715_v41  ;;  %v2323_v41 = vld [vmem:[%s1760_s18 + $0x240] sm:$0xff] }
 0x27d   : > { %742 = vmatpush.bf16.msrb.mxu1 %v716_v28  ;;  %v2326_v28 = vld [vmem:[%s1760_s18 + $0x250] sm:$0xff] }
 0x27e   : > { %v855_v26 = vpack.c.bf16 %v2326_v28, %v2323_v41 }
 0x280   : > { %730 = vmatpush.bf16.msrb.mxu0 %v713_v55  ;;  %v2339_v55 = vld [vmem:[%s1760_s18 + $0x220] sm:$0xff] }
 0x281   : > { %743 = vmatpush.bf16.msrb.mxu1 %v714_v3  ;;  %v2342_v3 = vld [vmem:[%s1760_s18 + $0x230] sm:$0xff] }
 0x282   : > { %v853_v14 = vpack.c.bf16 %v2342_v3, %v2339_v55 }
 0x284   : > { %731 = vmatpush.bf16.msrb.mxu0 %v711_v56  ;;  %v2355_v56 = vld [vmem:[%s1760_s18 + $0x200] sm:$0xff] }
 0x285   : > { %744 = vmatpush.bf16.msrb.mxu1 %v712_v21  ;;  %v2358_v21 = vld [vmem:[%s1760_s18 + $0x210] sm:$0xff] }
 0x288   : > { %732 = vmatpush.bf16.msrb.mxu0 %v709_v38 }
 0x289   : > { %745 = vmatpush.bf16.msrb.mxu1 %v710_v42 }
 0x28b   : > { %733 = vmatmul.bf16.vlgmr.msrb.gmra.mxu0 %v2013_v34 }
 0x28c   : > { %867 = vmatpush.bf16.msra.mxu0 %v865_v25  ;;  %746 = vmatmul.bf16.vlgmr.msrb.gmra.mxu1 %v2013_v34  ;;  %v851_v25 = vpack.c.bf16 %v2358_v21, %v2355_v56 }
 0x28d   : > { %916 = vmatpush.bf16.msra.mxu1 %v866_v62  ;;  %v852_v62 = vpack.c.bf16 %v2364_v5, %v2361_v22 }
 0x290   : > { %868 = vmatpush.bf16.msra.mxu0 %v863_v36 }
 0x291   : > { %917 = vmatpush.bf16.msra.mxu1 %v864_v37 }
 0x294   : > { %869 = vmatpush.bf16.msra.mxu0 %v861_v47 }
 0x295   : > { %918 = vmatpush.bf16.msra.mxu1 %v862_v4 }
 0x298   : > { %870 = vmatpush.bf16.msra.mxu0 %v859_v16 }
 0x299   : > { %919 = vmatpush.bf16.msra.mxu1 %v860_v57 }
 0x29c   : > { %871 = vmatpush.bf16.msra.mxu0 %v857_v10 }
 0x29d   : > { %920 = vmatpush.bf16.msra.mxu1 %v858_v11  ;;  %v2919_v11 = vld [vmem:[#allocation31_spill] sm:$0xff] }
 0x2a0   : > { %872 = vmatpush.bf16.msra.mxu0 %v855_v26 }
 0x2a1   : > { %921 = vmatpush.bf16.msra.mxu1 %v856_v9  ;;  %v2920_v9 = vld [vmem:[#allocation26_spill] sm:$0xff] }
 0x2a4   : > { %873 = vmatpush.bf16.msra.mxu0 %v853_v14 }
 0x2a5   : > { %922 = vmatpush.bf16.msra.mxu1 %v854_v59  ;;  %v2921_v59 = vld [vmem:[#allocation27_spill] sm:$0xff] }
 0x2a8   : > { %874 = vmatpush.bf16.msra.mxu0 %v851_v25 }
 0x2a9   : > { %923 = vmatpush.bf16.msra.mxu1 %v852_v62  ;;  %v2922_v62 = vld [vmem:[#allocation25_spill] sm:$0xff] }
 0x2ab   : > { %875 = vmatmul.bf16.vlgmr.msra.gmra.mxu0 %v1893_v48 }
 0x2ac   : > { %924 = vmatmul.bf16.vlgmr.msra.gmra.mxu1 %v1893_v48 }
 0x2bb   : > { %880 = vmatmul.bf16.gmra.mxu0 %v1900_v49 }
 0x2bc   : > { %929 = vmatmul.bf16.gmra.mxu1 %v1900_v49 }
 0x2cb   : > { %885 = vmatmul.bf16.gmra.mxu0 %v1907_v50 }
 0x2cc   : > { %934 = vmatmul.bf16.gmra.mxu1 %v1907_v50 }
 0x2db   : > { %890 = vmatmul.bf16.gmra.mxu0 %v1914_v51 }
 0x2dc   : > { %939 = vmatmul.bf16.gmra.mxu1 %v1914_v51 }
 0x2eb   : > { %895 = vmatmul.bf16.gmra.mxu0 %v1921_v52 }
 0x2ec   : > { %944 = vmatmul.bf16.gmra.mxu1 %v1921_v52 }
 0x2fb   : > { %900 = vmatmul.bf16.gmra.mxu0 %v1928_v53 }
 0x2fc   : > { %949 = vmatmul.bf16.gmra.mxu1 %v1928_v53 }
 0x308   : > { %v734_v48 = vpop.f32.mrf.mxu0 }
 0x309   : > { %v747_v49 = vpop.f32.mrf.mxu1  ;;  %v751_v50 = vperm.slane %v734_v48, 0  ;;  %v2923_v48 = vld [vmem:[#allocation48_spill] sm:$0xff] }
 0x30a   : > { %v752_v10 = vperm.slane %v747_v49, 0 }
 0x30b   : > { %905 = vmatmul.bf16.gmra.mxu0 %v1935_v54  ;;  %v753_v51 = vmul.f32 %v2102_v63, %v751_v50  ;;  %v755_v38 = vmul.f32 %v2105_v61, %v751_v50  ;;  %v757_v52 = vmul.f32 %v2086_v44, %v751_v50  ;;  %v759_v42 = vmul.f32 %v2089_v45, %v751_v50  ;;  %v2914_v45 = vld [vmem:[#allocation38_spill] sm:$0xff] }
 0x30c   : > { %954 = vmatmul.bf16.gmra.mxu1 %v1935_v54  ;;  %v761_v53 = vmul.f32 %v2070_v6, %v751_v50  ;;  %v763_v54 = vmul.f32 %v2073_v12, %v751_v50  ;;  %v765_v36 = vmul.f32 %v2054_v27, %v751_v50  ;;  %v767_v63 = vmul.f32 %v2057_v32, %v751_v50  ;;  %v2915_v6 = vld [vmem:[#allocation39_spill] sm:$0xff]  ;;  %v2916_v12 = vld [vmem:[#allocation34_spill] sm:$0xff] }
 0x30d   : > { %1527 = vst [vmem:[%s2136_s13 + $0x100] sm:$0xff] %v753_v51  ;;  %v769_v37 = vmul.f32 %v2914_v45, %v751_v50  ;;  %v771_v47 = vmul.f32 %v2915_v6, %v751_v50  ;;  %v773_v4 = vmul.f32 %v2916_v12, %v751_v50  ;;  %v2917_v27 = vld [vmem:[#allocation35_spill] sm:$0xff]  ;;  %v2918_v32 = vld [vmem:[#allocation30_spill] sm:$0xff]  ;;  %v779_v26 = vmul.f32 %v2919_v11, %v751_v50  ;;  %v2924_v51 = vld [vmem:[#allocation49_spill] sm:$0xff] }
 0x30e   : > { %1529 = vst [vmem:[%s2136_s13 + $0x110] sm:$0xff] %v755_v38  ;;  %v775_v16 = vmul.f32 %v2917_v27, %v751_v50  ;;  %v777_v57 = vmul.f32 %v2918_v32, %v751_v50  ;;  %v781_v14 = vmul.f32 %v2920_v9, %v751_v50  ;;  %v783_v25 = vmul.f32 %v2921_v59, %v751_v50  ;;  %v2926_v50 = vld [vmem:[#allocation47_spill] sm:$0xff] }
 0x30f   : > { %1531 = vst [vmem:[%s2136_s13 + $0x120] sm:$0xff] %v757_v52  ;;  %v754_v49 = vmul.f32 %v2923_v48, %v752_v10  ;;  %v756_v38 = vmul.f32 %v2924_v51, %v752_v10  ;;  %v2925_v52 = vld [vmem:[#allocation46_spill] sm:$0xff]  ;;  %v2937_v48 = vld [vmem:[#allocation28_spill] sm:$0xff]  ;;  %v2938_v51 = vld [vmem:[#allocation29_spill] sm:$0xff] }
 0x310   : > { %1533 = vst [vmem:[%s2136_s13 + $0x130] sm:$0xff] %v759_v42  ;;  %v736_v61 = vpop.f32.mrf.mxu0  ;;  %v758_v42 = vmul.f32 %v2925_v52, %v752_v10 }
 0x311   : > { %v749_v44 = vpop.f32.mrf.mxu1  ;;  %1535 = vst [vmem:[%s2136_s13 + $0x140] sm:$0xff] %v761_v53  ;;  %v760_v53 = vmul.f32 %v2926_v50, %v752_v10 }
 0x312   : > { %1537 = vst [vmem:[%s2136_s13 + $0x150] sm:$0xff] %v763_v54  ;;  %v2927_v54 = vld [vmem:[#allocation44_spill] sm:$0xff]  ;;  %v2929_v44 = vld [vmem:[#allocation42_spill] sm:$0xff] }
 0x313   : > { %1539 = vst [vmem:[%s2136_s13 + $0x160] sm:$0xff] %v765_v36  ;;  %v762_v36 = vmul.f32 %v2927_v54, %v752_v10  ;;  %v766_v45 = vmul.f32 %v2929_v44, %v752_v10 }
 0x314   : > { %1541 = vst [vmem:[%s2136_s13 + $0x170] sm:$0xff] %v767_v63  ;;  %v2928_v63 = vld [vmem:[#allocation45_spill] sm:$0xff] }
 0x315   : > { %1543 = vst [vmem:[%s2136_s13 + $0x180] sm:$0xff] %v769_v37  ;;  %v764_v61 = vmul.f32 %v2928_v63, %v752_v10  ;;  %v2930_v37 = vld [vmem:[#allocation43_spill] sm:$0xff] }
 0x316   : > { %1545 = vst [vmem:[%s2136_s13 + $0x190] sm:$0xff] %v771_v47  ;;  %v768_v6 = vmul.f32 %v2930_v37, %v752_v10  ;;  %v2931_v47 = vld [vmem:[#allocation40_spill] sm:$0xff] }
 0x317   : > { %1547 = vst [vmem:[%s2136_s13 + $0x1a0] sm:$0xff] %v773_v4  ;;  %v770_v12 = vmul.f32 %v2931_v47, %v752_v10  ;;  %v2932_v4 = vld [vmem:[#allocation41_spill] sm:$0xff] }
 0x318   : > { %1549 = vst [vmem:[%s2136_s13 + $0x1b0] sm:$0xff] %v775_v16  ;;  %v772_v27 = vmul.f32 %v2932_v4, %v752_v10  ;;  %v2933_v16 = vld [vmem:[#allocation36_spill] sm:$0xff] }
 0x319   : > { %1551 = vst [vmem:[%s2136_s13 + $0x1c0] sm:$0xff] %v777_v57  ;;  %v774_v32 = vmul.f32 %v2933_v16, %v752_v10  ;;  %v2934_v57 = vld [vmem:[#allocation37_spill] sm:$0xff] }
 0x31a   : > { %1553 = vst [vmem:[%s2136_s13 + $0x1d0] sm:$0xff] %v779_v26  ;;  %v776_v11 = vmul.f32 %v2934_v57, %v752_v10  ;;  %v2935_v26 = vld [vmem:[#allocation32_spill] sm:$0xff] }
 0x31b   : > { %910 = vmatmul.bf16.gmra.mxu0 %v2922_v62  ;;  %1555 = vst [vmem:[%s2136_s13 + $0x1e0] sm:$0xff] %v781_v14  ;;  %v778_v9 = vmul.f32 %v2935_v26, %v752_v10 }
 0x31c   : > { %959 = vmatmul.bf16.gmra.mxu1 %v2922_v62  ;;  %1557 = vst [vmem:[%s2136_s13 + $0x1f0] sm:$0xff] %v783_v25  ;;  %v2936_v25 = vld [vmem:[#allocation33_spill] sm:$0xff] }
 0x31d   : > { %1528 = vst [vmem:[%s2136_s13 + $0x108] sm:$0xff] %v754_v49  ;;  %v780_v62 = vmul.f32 %v2936_v25, %v752_v10  ;;  %v782_v49 = vmul.f32 %v2937_v48, %v752_v10 }
 0x31e   : > { %1530 = vst [vmem:[%s2136_s13 + $0x118] sm:$0xff] %v756_v38  ;;  %v784_v38 = vmul.f32 %v2938_v51, %v752_v10 }
 0x31f   : > { %1532 = vst [vmem:[%s2136_s13 + $0x128] sm:$0xff] %v758_v42 }
 0x320   : > { %1534 = vst [vmem:[%s2136_s13 + $0x138] sm:$0xff] %v760_v53 }
 0x321   : > { %1536 = vst [vmem:[%s2136_s13 + $0x148] sm:$0xff] %v762_v36 }
 0x322   : > { %1538 = vst [vmem:[%s2136_s13 + $0x158] sm:$0xff] %v764_v61 }
 0x323   : > { %1540 = vst [vmem:[%s2136_s13 + $0x168] sm:$0xff] %v766_v45 }
 0x324   : > { %1542 = vst [vmem:[%s2136_s13 + $0x178] sm:$0xff] %v768_v6 }
 0x325   : > { %1544 = vst [vmem:[%s2136_s13 + $0x188] sm:$0xff] %v770_v12 }
 0x326   : > { %1546 = vst [vmem:[%s2136_s13 + $0x198] sm:$0xff] %v772_v27 }
 0x327   : > { %1548 = vst [vmem:[%s2136_s13 + $0x1a8] sm:$0xff] %v774_v32 }
 0x328   : > { %v876_v14 = vpop.f32.mrf.mxu0  ;;  %1550 = vst [vmem:[%s2136_s13 + $0x1b8] sm:$0xff] %v776_v11 }
 0x329   : > { %v925_v59 = vpop.f32.mrf.mxu1  ;;  %1552 = vst [vmem:[%s2136_s13 + $0x1c8] sm:$0xff] %v778_v9  ;;  %v965_v50 = vmax.f32 %v876_v14, 0.0 }
 0x32a   : > { %1554 = vst [vmem:[%s2136_s13 + $0x1d8] sm:$0xff] %v780_v62  ;;  %v966_v53 = vmax.f32 %v925_v59, 0.0 }
 0x32b   : > { %1556 = vst [vmem:[%s2136_s13 + $0x1e8] sm:$0xff] %v782_v49 }
 0x32c   : > { %1558 = vst [vmem:[%s2136_s13 + $0x1f8] sm:$0xff] %v784_v38 }
 0x330   : > { %v878_v52 = vpop.f32.mrf.mxu0 }
 0x331   : > { %v927_v42 = vpop.f32.mrf.mxu1  ;;  %v967_v54 = vmax.f32 %v878_v52, 0.0 }
 0x332   : > { %v968_v36 = vmax.f32 %v927_v42, 0.0 }
 0x333   : > { %v2450_v63 = vpack.c.bf16 %v967_v54, %v965_v50 }
 0x334   : > { %v2452_v61 = vpack.c.bf16 %v968_v36, %v966_v53 }
 0x338   : > { %v881_v44 = vpop.f32.mrf.mxu0 }
 0x339   : > { %v930_v45 = vpop.f32.mrf.mxu1  ;;  %v969_v10 = vmax.f32 %v881_v44, 0.0 }
 0x33a   : > { %v970_v47 = vmax.f32 %v930_v45, 0.0 }
 0x340   : > { %v883_v37 = vpop.f32.mrf.mxu0 }
 0x341   : > { %v932_v6 = vpop.f32.mrf.mxu1  ;;  %v971_v12 = vmax.f32 %v883_v37, 0.0 }
 0x342   : > { %v972_v4 = vmax.f32 %v932_v6, 0.0 }
 0x343   : > { %v2454_v27 = vpack.c.bf16 %v971_v12, %v969_v10 }
 0x344   : > { %v2456_v16 = vpack.c.bf16 %v972_v4, %v970_v47 }
 0x348   : > { %v886_v32 = vpop.f32.mrf.mxu0 }
 0x349   : > { %v935_v57 = vpop.f32.mrf.mxu1  ;;  %v973_v9 = vmax.f32 %v886_v32, 0.0 }
 0x34a   : > { %v974_v14 = vmax.f32 %v935_v57, 0.0 }
 0x350   : > { %v888_v11 = vpop.f32.mrf.mxu0 }
 0x351   : > { %v937_v26 = vpop.f32.mrf.mxu1  ;;  %v975_v59 = vmax.f32 %v888_v11, 0.0 }
 0x352   : > { %v976_v25 = vmax.f32 %v937_v26, 0.0 }
 0x353   : > { %v1001_v62 = vpack.c.bf16 %v975_v59, %v973_v9 }
 0x354   : > { %v1002_v48 = vpack.c.bf16 %v976_v25, %v974_v14 }
 0x358   : > { %v891_v49 = vpop.f32.mrf.mxu0 }
 0x359   : > { %v940_v51 = vpop.f32.mrf.mxu1  ;;  %v977_v42 = vmax.f32 %v891_v49, 0.0 }
 0x35a   : > { %v978_v50 = vmax.f32 %v940_v51, 0.0 }
 0x360   : > { %v893_v38 = vpop.f32.mrf.mxu0 }
 0x361   : > { %v942_v52 = vpop.f32.mrf.mxu1  ;;  %v979_v53 = vmax.f32 %v893_v38, 0.0 }
 0x362   : > { %v980_v54 = vmax.f32 %v942_v52, 0.0 }
 0x363   : > { %v1003_v36 = vpack.c.bf16 %v979_v53, %v977_v42 }
 0x364   : > { %v1004_v44 = vpack.c.bf16 %v980_v54, %v978_v50 }
 0x368   : > { %v896_v45 = vpop.f32.mrf.mxu0 }
 0x369   : > { %v945_v37 = vpop.f32.mrf.mxu1 }
 0x370   : > { %v898_v6 = vpop.f32.mrf.mxu0 }
 0x371   : > { %v947_v10 = vpop.f32.mrf.mxu1 }
 0x378   : > { %v901_v47 = vpop.f32.mrf.mxu0 }
 0x379   : > { %v950_v12 = vpop.f32.mrf.mxu1  ;;  %v985_v29 = vmax.f32 %v901_v47, 0.0  ;;  %v2516_v47 = vld [vmem:[%s1760_s18 + $0x390] sm:$0xff] }
 0x37a   : > { %v986_v60 = vmax.f32 %v950_v12, 0.0  ;;  %v2519_v12 = vld [vmem:[%s1760_s18 + $0x388] sm:$0xff] }
 0x37b   : > { %2945 = vst [vmem:[#allocation15_spill] sm:$0xff] %v2519_v12 }
 0x380   : > { %v903_v4 = vpop.f32.mrf.mxu0 }
 0x381   : > { %v952_v32 = vpop.f32.mrf.mxu1  ;;  %v987_v43 = vmax.f32 %v903_v4, 0.0  ;;  %v2522_v4 = vld [vmem:[%s1760_s18 + $0x398] sm:$0xff] }
 0x382   : > { %v988_v7 = vmax.f32 %v952_v32, 0.0  ;;  %2946 = vst [vmem:[#allocation16_spill] sm:$0xff] %v2522_v4  ;;  %v1148_v32 = vpack.c.bf16 %v2522_v4, %v2519_v12 }
 0x388   : > { %v906_v57 = vpop.f32.mrf.mxu0 }
 0x389   : > { %v955_v11 = vpop.f32.mrf.mxu1  ;;  %v989_v2 = vmax.f32 %v906_v57, 0.0  ;;  %v981_v57 = vmax.f32 %v896_v45, 0.0  ;;  %v2498_v45 = vld [vmem:[%s1760_s18 + $0x3b0] sm:$0xff] }
 0x38a   : > { %v990_v30 = vmax.f32 %v955_v11, 0.0  ;;  %v982_v11 = vmax.f32 %v945_v37, 0.0  ;;  %v2501_v37 = vld [vmem:[%s1760_s18 + $0x3a8] sm:$0xff] }
 0x38b   : > { %2943 = vst [vmem:[#allocation17_spill] sm:$0xff] %v2501_v37 }
 0x390   : > { %v908_v26 = vpop.f32.mrf.mxu0 }
 0x391   : > { %v957_v9 = vpop.f32.mrf.mxu1  ;;  %v991_v50 = vmax.f32 %v908_v26, 0.0  ;;  %v1007_v26 = vpack.c.bf16 %v987_v43, %v985_v29  ;;  %v2459_v43 = vld [vmem:[%s1760_s18 + $0x3e0] sm:$0xff] }
 0x392   : > { %v992_v53 = vmax.f32 %v957_v9, 0.0  ;;  %v1008_v9 = vpack.c.bf16 %v988_v7, %v986_v60  ;;  %v2468_v7 = vld [vmem:[%s1760_s18 + $0x3f8] sm:$0xff]  ;;  %v2477_v60 = vld [vmem:[%s1760_s18 + $0x3c0] sm:$0xff] }
 0x393   : > { %v1009_v31 = vpack.c.bf16 %v991_v50, %v989_v2  ;;  %2940 = vst [vmem:[#allocation22_spill] sm:$0xff] %v2468_v7  ;;  %v2545_v50 = vld [vmem:[%s1760_s18 + $0x340] sm:$0xff] }
 0x394   : > { %v1010_v15 = vpack.c.bf16 %v992_v53, %v990_v30  ;;  %v2462_v30 = vld [vmem:[%s1760_s18 + $0x3f0] sm:$0xff] }
 0x395   : > { %v1153_v29 = vpack.c.bf16 %v2462_v30, %v2459_v43  ;;  %v2548_v53 = vld [vmem:[%s1760_s18 + $0x350] sm:$0xff] }
 0x398   : > { %v911_v14 = vpop.f32.mrf.mxu0 }
 0x399   : > { %v960_v59 = vpop.f32.mrf.mxu1  ;;  %v993_v51 = vmax.f32 %v911_v14, 0.0  ;;  %v983_v14 = vmax.f32 %v898_v6, 0.0 }
 0x39a   : > { %v994_v38 = vmax.f32 %v960_v59, 0.0  ;;  %v984_v59 = vmax.f32 %v947_v10, 0.0  ;;  %v2513_v10 = vld [vmem:[%s1760_s18 + $0x380] sm:$0xff] }
 0x39c   : > { %v1006_v2 = vpack.c.bf16 %v984_v59, %v982_v11  ;;  %v1143_v59 = vpack.c.bf16 %v2548_v53, %v2545_v50  ;;  %v2567_v11 = vld [vmem:[%s1760_s18 + $0x328] sm:$0xff] }
 0x3a0   : > { %v913_v25 = vpop.f32.mrf.mxu0 }
 0x3a1   : > { %v962_v49 = vpop.f32.mrf.mxu1  ;;  %v995_v52 = vmax.f32 %v913_v25, 0.0  ;;  %v2529_v25 = vld [vmem:[%s1760_s18 + $0x360] sm:$0xff] }
 0x3a2   : > { %v996_v42 = vmax.f32 %v962_v49, 0.0  ;;  %v2532_v49 = vld [vmem:[%s1760_s18 + $0x370] sm:$0xff] }
 0x3a3   : > { %v1011_v54 = vpack.c.bf16 %v995_v52, %v993_v51  ;;  %v2535_v51 = vld [vmem:[%s1760_s18 + $0x368] sm:$0xff]  ;;  %v1145_v52 = vpack.c.bf16 %v2532_v49, %v2529_v25 }
 0x3a4   : > { %v1012_v18 = vpack.c.bf16 %v996_v42, %v994_v38  ;;  %v2538_v38 = vld [vmem:[%s1760_s18 + $0x378] sm:$0xff] }
 0x3a5   : > { %1013 = vmatpush.bf16.msra.mxu2 %v1011_v54  ;;  %v1146_v42 = vpack.c.bf16 %v2538_v38, %v2535_v51  ;;  %v2551_v54 = vld [vmem:[%s1760_s18 + $0x348] sm:$0xff] }
 0x3a6   : > { %1026 = vmatpush.bf16.msra.mxu3 %v1012_v18  ;;  %v1005_v18 = vpack.c.bf16 %v983_v14, %v981_v57  ;;  %v2554_v14 = vld [vmem:[%s1760_s18 + $0x358] sm:$0xff]  ;;  %v2564_v57 = vld [vmem:[%s1760_s18 + $0x330] sm:$0xff] }
 0x3a9   : > { %1014 = vmatpush.bf16.msra.mxu2 %v1009_v31  ;;  %v2465_v31 = vld [vmem:[%s1760_s18 + $0x3e8] sm:$0xff] }
 0x3aa   : > { %1027 = vmatpush.bf16.msra.mxu3 %v1010_v15  ;;  %2939 = vst [vmem:[#allocation21_spill] sm:$0xff] %v2465_v31  ;;  %v1154_v15 = vpack.c.bf16 %v2468_v7, %v2465_v31 }
 0x3ad   : > { %1015 = vmatpush.bf16.msra.mxu2 %v1007_v26  ;;  %v1144_v26 = vpack.c.bf16 %v2554_v14, %v2551_v54 }
 0x3ae   : > { %1028 = vmatpush.bf16.msra.mxu3 %v1008_v9  ;;  %v2561_v9 = vld [vmem:[%s1760_s18 + $0x320] sm:$0xff] }
 0x3b1   : > { %1016 = vmatpush.bf16.msra.mxu2 %v1005_v18  ;;  %v2570_v18 = vld [vmem:[%s1760_s18 + $0x338] sm:$0xff] }
 0x3b2   : > { %1029 = vmatpush.bf16.msra.mxu3 %v1006_v2  ;;  %v1141_v2 = vpack.c.bf16 %v2564_v57, %v2561_v9 }
 0x3b5   : > { %1017 = vmatpush.bf16.msra.mxu2 %v1003_v36  ;;  %v2486_v36 = vld [vmem:[%s1760_s18 + $0x3d8] sm:$0xff] }
 0x3b6   : > { %1030 = vmatpush.bf16.msra.mxu3 %v1004_v44  ;;  %2942 = vst [vmem:[#allocation20_spill] sm:$0xff] %v2486_v36  ;;  %v2495_v44 = vld [vmem:[%s1760_s18 + $0x3a0] sm:$0xff] }
 0x3b9   : > { %1018 = vmatpush.bf16.msra.mxu2 %v1001_v62  ;;  %v2480_v62 = vld [vmem:[%s1760_s18 + $0x3d0] sm:$0xff] }
 0x3ba   : > { %1031 = vmatpush.bf16.msra.mxu3 %v1002_v48  ;;  %v2483_v48 = vld [vmem:[%s1760_s18 + $0x3c8] sm:$0xff] }
 0x3bb   : > { %2941 = vst [vmem:[#allocation19_spill] sm:$0xff] %v2483_v48 }
 0x3bd   : > { %1019 = vmatpush.bf16.msra.mxu2 %v2454_v27  ;;  %v1151_v27 = vpack.c.bf16 %v2480_v62, %v2477_v60 }
 0x3be   : > { %1032 = vmatpush.bf16.msra.mxu3 %v2456_v16  ;;  %v1152_v16 = vpack.c.bf16 %v2486_v36, %v2483_v48 }
 0x3c1   : > { %1020 = vmatpush.bf16.msra.mxu2 %v2450_v63  ;;  %v2504_v63 = vld [vmem:[%s1760_s18 + $0x3b8] sm:$0xff] }
 0x3c2   : > { %1033 = vmatpush.bf16.msra.mxu3 %v2452_v61  ;;  %2944 = vst [vmem:[#allocation18_spill] sm:$0xff] %v2504_v63  ;;  %v1149_v61 = vpack.c.bf16 %v2498_v45, %v2495_v44  ;;  %v1150_v6 = vpack.c.bf16 %v2504_v63, %v2501_v37 }
 0x3c4   : > { %1021 = vmatmul.bf16.vlgmr.msra.gmra.mxu2 %v2013_v34 }
 0x3c5   : > { %1155 = vmatpush.bf16.msrb.mxu2 %v1153_v29  ;;  %1034 = vmatmul.bf16.vlgmr.msra.gmra.mxu3 %v2013_v34  ;;  %v1147_v34 = vpack.c.bf16 %v2516_v47, %v2513_v10  ;;  %v1142_v29 = vpack.c.bf16 %v2570_v18, %v2567_v11 }
 0x3c6   : > { %1204 = vmatpush.bf16.msrb.mxu3 %v1154_v15  ;;  %v2577_v15 = vld [vmem:[%s1760_s18 + $0x300] sm:$0xff] }
 0x3c9   : > { %1156 = vmatpush.bf16.msrb.mxu2 %v1151_v27  ;;  %v2580_v27 = vld [vmem:[%s1760_s18 + $0x310] sm:$0xff] }
 0x3ca   : > { %1205 = vmatpush.bf16.msrb.mxu3 %v1152_v16  ;;  %v2583_v16 = vld [vmem:[%s1760_s18 + $0x308] sm:$0xff] }
 0x3cd   : > { %1157 = vmatpush.bf16.msrb.mxu2 %v1149_v61  ;;  %v2586_v61 = vld [vmem:[%s1760_s18 + $0x318] sm:$0xff] }
 0x3ce   : > { %1206 = vmatpush.bf16.msrb.mxu3 %v1150_v6  ;;  %v1139_v6 = vpack.c.bf16 %v2580_v27, %v2577_v15 }
 0x3d1   : > { %1158 = vmatpush.bf16.msrb.mxu2 %v1147_v34  ;;  %v1140_v34 = vpack.c.bf16 %v2586_v61, %v2583_v16 }
 0x3d2   : > { %1207 = vmatpush.bf16.msrb.mxu3 %v1148_v32  ;;  %v1707_v32 = vld [vmem:[%s2763_s1] sm:$0xff] }
 0x3d5   : > { %1159 = vmatpush.bf16.msrb.mxu2 %v1145_v52  ;;  %v1708_v52 = vld [vmem:[%s2763_s1 + $0x8] sm:$0xff] }
 0x3d6   : > { %1208 = vmatpush.bf16.msrb.mxu3 %v1146_v42  ;;  %v1709_v42 = vld [vmem:[%s2763_s1 + $0x10] sm:$0xff] }
 0x3d9   : > { %1160 = vmatpush.bf16.msrb.mxu2 %v1143_v59  ;;  %v1710_v59 = vld [vmem:[%s2763_s1 + $0x18] sm:$0xff] }
 0x3da   : > { %1209 = vmatpush.bf16.msrb.mxu3 %v1144_v26  ;;  %v1711_v26 = vld [vmem:[%s2763_s1 + $0x20] sm:$0xff] }
 0x3dd   : > { %1161 = vmatpush.bf16.msrb.mxu2 %v1141_v2  ;;  %v1712_v2 = vld [vmem:[%s2763_s1 + $0x28] sm:$0xff] }
 0x3de   : > { %1210 = vmatpush.bf16.msrb.mxu3 %v1142_v29  ;;  %v1713_v29 = vld [vmem:[%s2763_s1 + $0x30] sm:$0xff] }
 0x3e1   : > { %1162 = vmatpush.bf16.msrb.mxu2 %v1139_v6 }
 0x3e2   : > { %1211 = vmatpush.bf16.msrb.mxu3 %v1140_v34 }
 0x3e4   : > { %1163 = vmatmul.bf16.vlgmr.msrb.gmra.mxu2 %v1707_v32 }
 0x3e5   : > { %1212 = vmatmul.bf16.vlgmr.msrb.gmra.mxu3 %v1707_v32 }
 0x3f4   : > { %1168 = vmatmul.bf16.gmra.mxu2 %v1708_v52 }
 0x3f5   : > { %1217 = vmatmul.bf16.gmra.mxu3 %v1708_v52 }
 0x404   : > { %1173 = vmatmul.bf16.gmra.mxu2 %v1709_v42 }
 0x405   : > { %1222 = vmatmul.bf16.gmra.mxu3 %v1709_v42 }
 0x414   : > { %1178 = vmatmul.bf16.gmra.mxu2 %v1710_v59 }
 0x415   : > { %1227 = vmatmul.bf16.gmra.mxu3 %v1710_v59 }
 0x424   : > { %1183 = vmatmul.bf16.gmra.mxu2 %v1711_v26 }
 0x425   : > { %1232 = vmatmul.bf16.gmra.mxu3 %v1711_v26 }
 0x434   : > { %1188 = vmatmul.bf16.gmra.mxu2 %v1712_v2 }
 0x435   : > { %1237 = vmatmul.bf16.gmra.mxu3 %v1712_v2 }
 0x444   : > { %1193 = vmatmul.bf16.gmra.mxu2 %v1713_v29 }
 0x445   : > { %1242 = vmatmul.bf16.gmra.mxu3 %v1713_v29 }
 0x447   : > { %v1022_v6 = vpop.f32.mrf.mxu2 }
 0x448   : > { %v1035_v34 = vpop.f32.mrf.mxu3  ;;  %v1039_v32 = vperm.slane %v1022_v6, 0 }
 0x44a   : > { %v1041_v52 = vmul.f32 %v2355_v56, %v1039_v32  ;;  %v1043_v42 = vmul.f32 %v2358_v21, %v1039_v32  ;;  %v1045_v59 = vmul.f32 %v2339_v55, %v1039_v32  ;;  %v1047_v26 = vmul.f32 %v2342_v3, %v1039_v32 }
 0x44b   : > { %v1049_v2 = vmul.f32 %v2323_v41, %v1039_v32  ;;  %v1051_v7 = vmul.f32 %v2326_v28, %v1039_v32  ;;  %v1053_v29 = vmul.f32 %v2307_v1, %v1039_v32  ;;  %v1055_v56 = vmul.f32 %v2310_v13, %v1039_v32  ;;  %v1714_v1 = vld [vmem:[%s2763_s1 + $0x38] sm:$0xff] }
 0x44c   : > { %1591 = vst [vmem:[%s2136_s13 + $0x200] sm:$0xff] %v1041_v52  ;;  %v1057_v55 = vmul.f32 %v2291_v8, %v1039_v32  ;;  %v1059_v41 = vmul.f32 %v2294_v0, %v1039_v32  ;;  %v1061_v28 = vmul.f32 %v2273_v39, %v1039_v32  ;;  %v1063_v8 = vmul.f32 %v2276_v35, %v1039_v32 }
 0x44d   : > { %1593 = vst [vmem:[%s2136_s13 + $0x210] sm:$0xff] %v1043_v42  ;;  %v1065_v0 = vmul.f32 %v2257_v33, %v1039_v32  ;;  %v1040_v13 = vperm.slane %v1035_v34, 0  ;;  %v1067_v39 = vmul.f32 %v2260_v40, %v1039_v32  ;;  %v1069_v3 = vmul.f32 %v2237_v24, %v1039_v32 }
 0x44e   : > { %1595 = vst [vmem:[%s2136_s13 + $0x220] sm:$0xff] %v1045_v59 }
 0x44f   : > { %1597 = vst [vmem:[%s2136_s13 + $0x230] sm:$0xff] %v1047_v26  ;;  %v1024_v21 = vpop.f32.mrf.mxu2  ;;  %v1042_v35 = vmul.f32 %v2361_v22, %v1040_v13  ;;  %v1044_v33 = vmul.f32 %v2364_v5, %v1040_v13  ;;  %v1046_v40 = vmul.f32 %v2345_v58, %v1040_v13  ;;  %v1048_v24 = vmul.f32 %v2348_v17, %v1040_v13  ;;  %v2947_v5 = vld [vmem:[#allocation24_spill] sm:$0xff]  ;;  %v2948_v58 = vld [vmem:[#allocation3_spill] sm:$0xff] }
 0x450   : > { %v1037_v6 = vpop.f32.mrf.mxu3  ;;  %1599 = vst [vmem:[%s2136_s13 + $0x240] sm:$0xff] %v1049_v2  ;;  %v1052_v34 = vmul.f32 %v2332_v46, %v1040_v13  ;;  %v1054_v22 = vmul.f32 %v2313_v19, %v1040_v13  ;;  %v1058_v52 = vmul.f32 %v2948_v58, %v1040_v13  ;;  %v2949_v17 = vld [vmem:[#allocation23_spill] sm:$0xff]  ;;  %v2951_v19 = vld [vmem:[#allocation2_spill] sm:$0xff] }
 0x451   : > { %1601 = vst [vmem:[%s2136_s13 + $0x250] sm:$0xff] %v1051_v7  ;;  %v1071_v7 = vmul.f32 %v2242_v20, %v1039_v32  ;;  %v1050_v20 = vmul.f32 %v2329_v23, %v1040_v13  ;;  %v1056_v32 = vmul.f32 %v2947_v5, %v1040_v13  ;;  %v1060_v42 = vmul.f32 %v2949_v17, %v1040_v13  ;;  %v2950_v23 = vld [vmem:[#allocation7_spill] sm:$0xff]  ;;  %v2953_v21 = vld [vmem:[#allocation6_spill] sm:$0xff] }
 0x452   : > { %1603 = vst [vmem:[%s2136_s13 + $0x260] sm:$0xff] %v1053_v29  ;;  %v1062_v46 = vmul.f32 %v2950_v23, %v1040_v13  ;;  %v1064_v59 = vmul.f32 %v2951_v19, %v1040_v13  ;;  %v2952_v26 = vld [vmem:[#allocation11_spill] sm:$0xff]  ;;  %v1068_v6 = vmul.f32 %v2953_v21, %v1040_v13 }
 0x453   : > { %1605 = vst [vmem:[%s2136_s13 + $0x270] sm:$0xff] %v1055_v56  ;;  %v1066_v2 = vmul.f32 %v2952_v26, %v1040_v13 }
 0x454   : > { %1198 = vmatmul.bf16.gmra.mxu2 %v1714_v1  ;;  %1607 = vst [vmem:[%s2136_s13 + $0x280] sm:$0xff] %v1057_v55  ;;  %v2954_v55 = vld [vmem:[#allocation14_spill] sm:$0xff] }
 0x455   : > { %1247 = vmatmul.bf16.gmra.mxu3 %v1714_v1  ;;  %1609 = vst [vmem:[%s2136_s13 + $0x290] sm:$0xff] %v1059_v41  ;;  %v1070_v41 = vmul.f32 %v2954_v55, %v1040_v13 }
 0x456   : > { %1611 = vst [vmem:[%s2136_s13 + $0x2a0] sm:$0xff] %v1061_v28  ;;  %v2955_v28 = vld [vmem:[#allocation10_spill] sm:$0xff] }
 0x457   : > { %1613 = vst [vmem:[%s2136_s13 + $0x2b0] sm:$0xff] %v1063_v8  ;;  %v1072_v1 = vmul.f32 %v2955_v28, %v1040_v13 }
 0x458   : > { %1615 = vst [vmem:[%s2136_s13 + $0x2c0] sm:$0xff] %v1065_v0 }
 0x459   : > { %1617 = vst [vmem:[%s2136_s13 + $0x2d0] sm:$0xff] %v1067_v39 }
 0x45a   : > { %1619 = vst [vmem:[%s2136_s13 + $0x2e0] sm:$0xff] %v1069_v3 }
 0x45b   : > { %1621 = vst [vmem:[%s2136_s13 + $0x2f0] sm:$0xff] %v1071_v7 }
 0x45c   : > { %1592 = vst [vmem:[%s2136_s13 + $0x208] sm:$0xff] %v1042_v35 }
 0x45d   : > { %1594 = vst [vmem:[%s2136_s13 + $0x218] sm:$0xff] %v1044_v33 }
 0x45e   : > { %1596 = vst [vmem:[%s2136_s13 + $0x228] sm:$0xff] %v1046_v40 }
 0x45f   : > { %1598 = vst [vmem:[%s2136_s13 + $0x238] sm:$0xff] %v1048_v24 }
 0x460   : > { %1600 = vst [vmem:[%s2136_s13 + $0x248] sm:$0xff] %v1050_v20 }
 0x461   : > { %1602 = vst [vmem:[%s2136_s13 + $0x258] sm:$0xff] %v1052_v34 }
 0x462   : > { %1604 = vst [vmem:[%s2136_s13 + $0x268] sm:$0xff] %v1054_v22 }
 0x463   : > { %1606 = vst [vmem:[%s2136_s13 + $0x278] sm:$0xff] %v1056_v32 }
 0x464   : > { %1608 = vst [vmem:[%s2136_s13 + $0x288] sm:$0xff] %v1058_v52 }
 0x465   : > { %1610 = vst [vmem:[%s2136_s13 + $0x298] sm:$0xff] %v1060_v42 }
 0x466   : > { %1612 = vst [vmem:[%s2136_s13 + $0x2a8] sm:$0xff] %v1062_v46 }
 0x467   : > { %v1164_v29 = vpop.f32.mrf.mxu2  ;;  %1614 = vst [vmem:[%s2136_s13 + $0x2b8] sm:$0xff] %v1064_v59 }
 0x468   : > { %v1213_v56 = vpop.f32.mrf.mxu3  ;;  %1616 = vst [vmem:[%s2136_s13 + $0x2c8] sm:$0xff] %v1066_v2  ;;  %v1253_v39 = vmax.f32 %v1164_v29, 0.0 }
 0x469   : > { %1618 = vst [vmem:[%s2136_s13 + $0x2d8] sm:$0xff] %v1068_v6  ;;  %v1254_v3 = vmax.f32 %v1213_v56, 0.0 }
 0x46a   : > { %1620 = vst [vmem:[%s2136_s13 + $0x2e8] sm:$0xff] %v1070_v41 }
 0x46b   : > { %1622 = vst [vmem:[%s2136_s13 + $0x2f8] sm:$0xff] %v1072_v1 }
 0x46f   : > { %v1166_v8 = vpop.f32.mrf.mxu2 }
 0x470   : > { %v1215_v0 = vpop.f32.mrf.mxu3  ;;  %v1255_v7 = vmax.f32 %v1166_v8, 0.0 }
 0x471   : > { %v1256_v35 = vmax.f32 %v1215_v0, 0.0 }
 0x472   : > { %v2680_v33 = vpack.c.bf16 %v1255_v7, %v1253_v39 }
 0x473   : > { %v2682_v40 = vpack.c.bf16 %v1256_v35, %v1254_v3 }
 0x477   : > { %v1169_v24 = vpop.f32.mrf.mxu2 }
 0x478   : > { %v1218_v20 = vpop.f32.mrf.mxu3  ;;  %v1257_v13 = vmax.f32 %v1169_v24, 0.0 }
 0x479   : > { %v1258_v5 = vmax.f32 %v1218_v20, 0.0 }
 0x47f   : > { %v1171_v34 = vpop.f32.mrf.mxu2 }
 0x480   : > { %v1220_v22 = vpop.f32.mrf.mxu3  ;;  %v1259_v32 = vmax.f32 %v1171_v34, 0.0 }
 0x481   : > { %v1260_v58 = vmax.f32 %v1220_v22, 0.0 }
 0x482   : > { %v2684_v52 = vpack.c.bf16 %v1259_v32, %v1257_v13 }
 0x483   : > { %v2686_v17 = vpack.c.bf16 %v1260_v58, %v1258_v5 }
 0x487   : > { %v1174_v42 = vpop.f32.mrf.mxu2 }
 0x488   : > { %v1223_v23 = vpop.f32.mrf.mxu3  ;;  %v1261_v59 = vmax.f32 %v1174_v42, 0.0 }
 0x489   : > { %v1262_v26 = vmax.f32 %v1223_v23, 0.0 }
 0x48f   : > { %v1176_v46 = vpop.f32.mrf.mxu2 }
 0x490   : > { %v1225_v19 = vpop.f32.mrf.mxu3  ;;  %v1263_v2 = vmax.f32 %v1176_v46, 0.0 }
 0x491   : > { %v1264_v29 = vmax.f32 %v1225_v19, 0.0 }
 0x492   : > { %v1289_v56 = vpack.c.bf16 %v1263_v2, %v1261_v59 }
 0x493   : > { %v1290_v21 = vpack.c.bf16 %v1264_v29, %v1262_v26 }
 0x497   : > { %v1179_v6 = vpop.f32.mrf.mxu2 }
 0x498   : > { %v1228_v55 = vpop.f32.mrf.mxu3  ;;  %v1265_v1 = vmax.f32 %v1179_v6, 0.0 }
 0x499   : > { %v1266_v8 = vmax.f32 %v1228_v55, 0.0 }
 0x49f   : > { %v1181_v41 = vpop.f32.mrf.mxu2 }
 0x4a0   : > { %v1230_v28 = vpop.f32.mrf.mxu3  ;;  %v1267_v0 = vmax.f32 %v1181_v41, 0.0 }
 0x4a1   : > { %v1268_v39 = vmax.f32 %v1230_v28, 0.0 }
 0x4a2   : > { %v1291_v3 = vpack.c.bf16 %v1267_v0, %v1265_v1 }
 0x4a3   : > { %v1292_v7 = vpack.c.bf16 %v1268_v39, %v1266_v8 }
 0x4a7   : > { %v1184_v35 = vpop.f32.mrf.mxu2 }
 0x4a8   : > { %v1233_v24 = vpop.f32.mrf.mxu3 }
 0x4af   : > { %v1186_v20 = vpop.f32.mrf.mxu2 }
 0x4b0   : > { %v1235_v34 = vpop.f32.mrf.mxu3 }
 0x4b7   : > { %v1189_v22 = vpop.f32.mrf.mxu2 }
 0x4b8   : > { %v1238_v13 = vpop.f32.mrf.mxu3  ;;  %v1273_v4 = vmax.f32 %v1189_v22, 0.0  ;;  %v2962_v22 = vld [vmem:[#allocation21_spill] sm:$0xff] }
 0x4b9   : > { %v1274_v12 = vmax.f32 %v1238_v13, 0.0 }
 0x4bf   : > { %v1191_v5 = vpop.f32.mrf.mxu2 }
 0x4c0   : > { %v1240_v32 = vpop.f32.mrf.mxu3  ;;  %v1275_v36 = vmax.f32 %v1191_v5, 0.0  ;;  %v2963_v5 = vld [vmem:[#allocation22_spill] sm:$0xff] }
 0x4c1   : > { %v1276_v48 = vmax.f32 %v1240_v32, 0.0 }
 0x4c7   : > { %v1194_v58 = vpop.f32.mrf.mxu2 }
 0x4c8   : > { %v1243_v42 = vpop.f32.mrf.mxu3  ;;  %v1277_v39 = vmax.f32 %v1194_v58, 0.0 }
 0x4c9   : > { %v1278_v31 = vmax.f32 %v1243_v42, 0.0 }
 0x4cf   : > { %v1196_v23 = vpop.f32.mrf.mxu2 }
 0x4d0   : > { %v1245_v46 = vpop.f32.mrf.mxu3  ;;  %v1279_v28 = vmax.f32 %v1196_v23, 0.0  ;;  %v1269_v23 = vmax.f32 %v1184_v35, 0.0 }
 0x4d1   : > { %v1280_v1 = vmax.f32 %v1245_v46, 0.0  ;;  %v1270_v46 = vmax.f32 %v1233_v24, 0.0  ;;  %v2960_v24 = vld [vmem:[#allocation19_spill] sm:$0xff] }
 0x4d2   : > { %v1297_v63 = vpack.c.bf16 %v1279_v28, %v1277_v39 }
 0x4d3   : > { %v1298_v37 = vpack.c.bf16 %v1280_v1, %v1278_v31  ;;  %v1715_v31 = vld [vmem:[%s2764_s2] sm:$0xf] }
 0x4d7   : > { %v1199_v19 = vpop.f32.mrf.mxu2 }
 0x4d8   : > { %v1248_v59 = vpop.f32.mrf.mxu3  ;;  %v1281_v29 = vmax.f32 %v1199_v19, 0.0  ;;  %v1271_v19 = vmax.f32 %v1186_v20, 0.0  ;;  %v2961_v20 = vld [vmem:[#allocation20_spill] sm:$0xff] }
 0x4d9   : > { %v1282_v6 = vmax.f32 %v1248_v59, 0.0  ;;  %v1272_v59 = vmax.f32 %v1235_v34, 0.0 }
 0x4da   : > { %v1293_v58 = vpack.c.bf16 %v1271_v19, %v1269_v23 }
 0x4db   : > { %v1294_v42 = vpack.c.bf16 %v1272_v59, %v1270_v46 }
 0x4df   : > { %v1201_v26 = vpop.f32.mrf.mxu2 }
 0x4e0   : > { %v1250_v2 = vpop.f32.mrf.mxu3  ;;  %v1283_v55 = vmax.f32 %v1201_v26, 0.0  ;;  %v1295_v26 = vpack.c.bf16 %v1275_v36, %v1273_v4 }
 0x4e1   : > { %v1284_v41 = vmax.f32 %v1250_v2, 0.0  ;;  %v1296_v2 = vpack.c.bf16 %v1276_v48, %v1274_v12 }
 0x4e2   : > { %v1299_v8 = vpack.c.bf16 %v1283_v55, %v1281_v29 }
 0x4e3   : > { %v1300_v0 = vpack.c.bf16 %v1284_v41, %v1282_v6 }
 0x4e4   : > { %1301 = vmatpush.bf16.msrb.mxu0 %v1299_v8 }
 0x4e5   : > { %1314 = vmatpush.bf16.msrb.mxu1 %v1300_v0 }
 0x4e8   : > { %1302 = vmatpush.bf16.msrb.mxu0 %v1297_v63 }
 0x4e9   : > { %1315 = vmatpush.bf16.msrb.mxu1 %v1298_v37 }
 0x4ec   : > { %1303 = vmatpush.bf16.msrb.mxu0 %v1295_v26 }
 0x4ed   : > { %1316 = vmatpush.bf16.msrb.mxu1 %v1296_v2 }
 0x4f0   : > { %1304 = vmatpush.bf16.msrb.mxu0 %v1293_v58 }
 0x4f1   : > { %1317 = vmatpush.bf16.msrb.mxu1 %v1294_v42 }
 0x4f4   : > { %1305 = vmatpush.bf16.msrb.mxu0 %v1291_v3 }
 0x4f5   : > { %1318 = vmatpush.bf16.msrb.mxu1 %v1292_v7 }
 0x4f8   : > { %1306 = vmatpush.bf16.msrb.mxu0 %v1289_v56 }
 0x4f9   : > { %1319 = vmatpush.bf16.msrb.mxu1 %v1290_v21 }
 0x4fc   : > { %1307 = vmatpush.bf16.msrb.mxu0 %v2684_v52 }
 0x4fd   : > { %1320 = vmatpush.bf16.msrb.mxu1 %v2686_v17 }
 0x500   : > { %1308 = vmatpush.bf16.msrb.mxu0 %v2680_v33 }
 0x501   : > { %1321 = vmatpush.bf16.msrb.mxu1 %v2682_v40 }
 0x503   : > { %1309 = vmatmul.bf16.vlgmr.msrb.gmra.mxu0 %v1715_v31 }
 0x504   : > { %1322 = vmatmul.bf16.vlgmr.msrb.gmra.mxu1 %v1715_v31 }
 0x580   : > { %v1310_v48 = vpop.f32.mrf.mxu0 }
 0x581   : > { %v1323_v36 = vpop.f32.mrf.mxu1  ;;  %v1327_v37 = vperm.slane %v1310_v48, 0 }
 0x582   : > { %v1328_v56 = vperm.slane %v1323_v36, 0 }
 0x583   : > { %v1329_v63 = vmul.f32 %v2577_v15, %v1327_v37  ;;  %v1331_v12 = vmul.f32 %v2580_v27, %v1327_v37  ;;  %v1333_v4 = vmul.f32 %v2561_v9, %v1327_v37  ;;  %v1335_v33 = vmul.f32 %v2564_v57, %v1327_v37 }
 0x584   : > { %v1337_v40 = vmul.f32 %v2545_v50, %v1327_v37  ;;  %v1339_v52 = vmul.f32 %v2548_v53, %v1327_v37  ;;  %v1341_v17 = vmul.f32 %v2529_v25, %v1327_v37  ;;  %v1343_v15 = vmul.f32 %v2532_v49, %v1327_v37 }
 0x585   : > { %1655 = vst [vmem:[%s2136_s13 + $0x300] sm:$0xff] %v1329_v63  ;;  %v1345_v57 = vmul.f32 %v2513_v10, %v1327_v37  ;;  %v1347_v50 = vmul.f32 %v2516_v47, %v1327_v37  ;;  %v1349_v53 = vmul.f32 %v2495_v44, %v1327_v37  ;;  %v1351_v25 = vmul.f32 %v2498_v45, %v1327_v37 }
 0x586   : > { %1657 = vst [vmem:[%s2136_s13 + $0x310] sm:$0xff] %v1331_v12  ;;  %v1353_v49 = vmul.f32 %v2477_v60, %v1327_v37  ;;  %v1355_v10 = vmul.f32 %v2480_v62, %v1327_v37  ;;  %v1357_v47 = vmul.f32 %v2459_v43, %v1327_v37  ;;  %v1359_v44 = vmul.f32 %v2462_v30, %v1327_v37 }
 0x587   : > { %1659 = vst [vmem:[%s2136_s13 + $0x320] sm:$0xff] %v1333_v4  ;;  %v1330_v45 = vmul.f32 %v2583_v16, %v1328_v56  ;;  %v1332_v60 = vmul.f32 %v2586_v61, %v1328_v56  ;;  %v1334_v62 = vmul.f32 %v2567_v11, %v1328_v56  ;;  %v1336_v43 = vmul.f32 %v2570_v18, %v1328_v56  ;;  %v2956_v11 = vld [vmem:[#allocation15_spill] sm:$0xff]  ;;  %v2957_v18 = vld [vmem:[#allocation16_spill] sm:$0xff] }
 0x588   : > { %1661 = vst [vmem:[%s2136_s13 + $0x330] sm:$0xff] %v1335_v33  ;;  %v1312_v27 = vpop.f32.mrf.mxu0  ;;  %v1338_v30 = vmul.f32 %v2551_v54, %v1328_v56  ;;  %v1340_v21 = vmul.f32 %v2554_v14, %v1328_v56  ;;  %v1342_v16 = vmul.f32 %v2535_v51, %v1328_v56  ;;  %v1344_v61 = vmul.f32 %v2538_v38, %v1328_v56  ;;  %v2958_v14 = vld [vmem:[#allocation17_spill] sm:$0xff]  ;;  %v2959_v51 = vld [vmem:[#allocation18_spill] sm:$0xff] }
 0x589   : > { %v1325_v9 = vpop.f32.mrf.mxu1  ;;  %1663 = vst [vmem:[%s2136_s13 + $0x340] sm:$0xff] %v1337_v40  ;;  %v1346_v3 = vmul.f32 %v2956_v11, %v1328_v56  ;;  %v1348_v54 = vmul.f32 %v2957_v18, %v1328_v56  ;;  %v1350_v7 = vmul.f32 %v2958_v14, %v1328_v56  ;;  %v1352_v35 = vmul.f32 %v2959_v51, %v1328_v56 }
 0x58a   : > { %1665 = vst [vmem:[%s2136_s13 + $0x350] sm:$0xff] %v1339_v52  ;;  %v1354_v38 = vmul.f32 %v2960_v24, %v1328_v56  ;;  %v1356_v34 = vmul.f32 %v2961_v20, %v1328_v56  ;;  %v1358_v13 = vmul.f32 %v2962_v22, %v1328_v56  ;;  %v1360_v32 = vmul.f32 %v2963_v5, %v1328_v56 }
 0x58b   : > { %1667 = vst [vmem:[%s2136_s13 + $0x360] sm:$0xff] %v1341_v17 }
 0x58c   : > { %1669 = vst [vmem:[%s2136_s13 + $0x370] sm:$0xff] %v1343_v15 }
 0x58d   : > { %1671 = vst [vmem:[%s2136_s13 + $0x380] sm:$0xff] %v1345_v57 }
 0x58e   : > { %1673 = vst [vmem:[%s2136_s13 + $0x390] sm:$0xff] %v1347_v50 }
 0x58f   : > { %1675 = vst [vmem:[%s2136_s13 + $0x3a0] sm:$0xff] %v1349_v53 }
 0x590   : > { %1677 = vst [vmem:[%s2136_s13 + $0x3b0] sm:$0xff] %v1351_v25 }
 0x591   : > { %1679 = vst [vmem:[%s2136_s13 + $0x3c0] sm:$0xff] %v1353_v49 }
 0x592   : > { %1681 = vst [vmem:[%s2136_s13 + $0x3d0] sm:$0xff] %v1355_v10 }
 0x593   : > { %1683 = vst [vmem:[%s2136_s13 + $0x3e0] sm:$0xff] %v1357_v47 }
 0x594   : > { %1685 = vst [vmem:[%s2136_s13 + $0x3f0] sm:$0xff] %v1359_v44 }
 0x595   : > { %1656 = vst [vmem:[%s2136_s13 + $0x308] sm:$0xff] %v1330_v45 }
 0x596   : > { %1658 = vst [vmem:[%s2136_s13 + $0x318] sm:$0xff] %v1332_v60 }
 0x597   : > { %1660 = vst [vmem:[%s2136_s13 + $0x328] sm:$0xff] %v1334_v62 }
 0x598   : > { %1662 = vst [vmem:[%s2136_s13 + $0x338] sm:$0xff] %v1336_v43 }
 0x599   : > { %1664 = vst [vmem:[%s2136_s13 + $0x348] sm:$0xff] %v1338_v30 }
 0x59a   : > { %1666 = vst [vmem:[%s2136_s13 + $0x358] sm:$0xff] %v1340_v21 }
 0x59b   : > { %1668 = vst [vmem:[%s2136_s13 + $0x368] sm:$0xff] %v1342_v16 }
 0x59c   : > { %1670 = vst [vmem:[%s2136_s13 + $0x378] sm:$0xff] %v1344_v61 }
 0x59d   : > { %1672 = vst [vmem:[%s2136_s13 + $0x388] sm:$0xff] %v1346_v3 }
 0x59e   : > { %1674 = vst [vmem:[%s2136_s13 + $0x398] sm:$0xff] %v1348_v54 }
 0x59f   : > { %1676 = vst [vmem:[%s2136_s13 + $0x3a8] sm:$0xff] %v1350_v7 }
 0x5a0   : > { %1678 = vst [vmem:[%s2136_s13 + $0x3b8] sm:$0xff] %v1352_v35 }
 0x5a1   : > { %1680 = vst [vmem:[%s2136_s13 + $0x3c8] sm:$0xff] %v1354_v38 }
 0x5a2   : > { %1682 = vst [vmem:[%s2136_s13 + $0x3d8] sm:$0xff] %v1356_v34 }
 0x5a3   : > { %1684 = vst [vmem:[%s2136_s13 + $0x3e8] sm:$0xff] %v1358_v13 }
 0x5a4   : > { %1686 = vst [vmem:[%s2136_s13 + $0x3f8] sm:$0xff] %v1360_v32 }
 0x5a5 PF: > { %s13_s12 = sadd.s32 1, %s1722_s12  }
 0x5a6   : > { %p10_p4 = scmp.ge.s32.totalorder %s13_s12, 4  }
 0x5a8   :  { %12 = sbr.rel (!%p10_p4) target bundleno = 1 (0x1), region = 68 }

</bundles_post_ra>
